<compile_context>
chip_gen: v6e
topology: v6e:2x2x1
jax: 0.10.0
libtpu: 0.0.40
codegen_flags: <defaults>
</compile_context>

<pallas_src>
import jax
import jax.numpy as jnp
from jax import lax
from jax.experimental import pallas as pl
from jax.experimental.pallas import tpu as pltpu


def _elu(x):
    # ELU(alpha=1): x if x > 0 else exp(x) - 1  (clamp inside exp for safety)
    return jnp.where(x > 0.0, x, jnp.exp(jnp.minimum(x, 0.0)) - 1.0)


def _iaf_kernel(z_ref, h_ref,
                w_zh_ref, b_zh_ref,
                w_hh_ref, b_hh_ref,
                w_mu_ref, b_mu_ref,
                w_var_ref, b_var_ref,
                z_out_ref, logdet_ref):
    # Working layout: features on sublanes, batch on lanes.
    z = z_ref[...].astype(jnp.float32)        # (Zd, TB)
    h_in = h_ref[...].astype(jnp.float32)     # (Hd, TB)
    z_dim, tb = z.shape
    h_dim = h_in.shape[0]
    n_flow = w_zh_ref.shape[0]
    n_hidden = w_hh_ref.shape[1]

    logdet = jnp.zeros((1, tb), jnp.float32)

    for i in range(n_flow):                   # static, tiny trip count
        # ---- z -> h : K = z_dim is tiny, unrolled VPU broadcast-FMA (no MXU)
        w_zh = w_zh_ref[i].astype(jnp.float32)   # (Hd, Zd), pre-masked/flipped
        b_zh = b_zh_ref[i].astype(jnp.float32)   # (Hd, 1)
        h0 = jnp.broadcast_to(b_zh, (h_dim, tb))
        for k in range(z_dim):
            h0 = h0 + w_zh[:, k:k + 1] * z[k:k + 1, :]
        hh = _elu(h0) + h_in

        # ---- hidden layers (Hd x Hd) on the MXU
        for d in range(n_hidden):
            w_hh = w_hh_ref[i, d].astype(jnp.float32)   # (Hd, Hd)
            b_hh = b_hh_ref[i, d].astype(jnp.float32)   # (Hd, 1)
            hh = _elu(jnp.dot(w_hh, hh, preferred_element_type=jnp.float32) + b_hh)

        # ---- h -> mu / var (strictly-lower-triangular, pre-masked weights)
        w_mu = w_mu_ref[i].astype(jnp.float32)    # (Zd, Hd)
        b_mu = b_mu_ref[i].astype(jnp.float32)    # (Zd, 1)
        mu = jnp.dot(w_mu, hh, preferred_element_type=jnp.float32) + b_mu

        w_var = w_var_ref[i].astype(jnp.float32)  # (Zd, Hd)
        b_var = b_var_ref[i].astype(jnp.float32)  # (Zd, 1)
        a = jnp.dot(w_var, hh, preferred_element_type=jnp.float32) + b_var

        # Fused numerically-stable sigmoid / log-sigmoid pair.
        e = jnp.exp(-jnp.abs(a))
        denom = 1.0 + e
        var = jnp.where(a >= 0.0, 1.0, e) / denom
        log_var = jnp.minimum(a, 0.0) - jnp.log(denom)

        z = mu + var * (z - mu)
        logdet = logdet + jnp.sum(log_var, axis=0, keepdims=True)

    z_out_ref[...] = z.astype(z_out_ref.dtype)
    logdet_ref[...] = logdet.astype(logdet_ref.dtype)


def _fold_step_params(params):
    """Host-side: apply tril masks and fold the flip(1) of even steps into weights."""
    w_zh, b_zh, w_hh, b_hh, w_mu, b_mu, w_var, b_var = params
    n_flow = w_zh.shape[0]

    w_zh_m = jnp.tril(w_zh)          # 'full' diag
    w_hh_m = jnp.tril(w_hh)          # 'full' diag
    w_mu_m = jnp.tril(w_mu, -1)      # 'zero' diag (strictly lower)
    w_var_m = jnp.tril(w_var, -1)

    def fold(arr, axis):
        return jnp.stack(
            [jnp.flip(arr[i], axis=axis) if i % 2 == 0 else arr[i]
             for i in range(n_flow)], axis=0)

    # Even steps: input flip -> reverse z-columns of W_zh; output flip ->
    # reverse output rows of W_mu/W_var and biases. logdet is flip-invariant.
    w_zh_eff = fold(w_zh_m, 1)
    w_mu_eff = fold(w_mu_m, 0)
    b_mu_eff = fold(b_mu, 0)
    w_var_eff = fold(w_var_m, 0)
    b_var_eff = fold(b_var, 0)
    return (w_zh_eff, b_zh, w_hh_m, b_hh, w_mu_eff, b_mu_eff, w_var_eff, b_var_eff)


def iaf_forward(z, h, params, *, batch_tile=1024):
    """Pallas equivalent of IAF.forward(z, h) -> (z_out, logdet) with scale=True.

    params = (w_zh, b_zh, w_hh, b_hh, w_mu, b_mu, w_var, b_var) with shapes
      w_zh: (F, Hd, Zd)      b_zh: (F, Hd)
      w_hh: (F, D, Hd, Hd)   b_hh: (F, D, Hd)
      w_mu: (F, Zd, Hd)      b_mu: (F, Zd)
      w_var:(F, Zd, Hd)      b_var:(F, Zd)
    """
    B, z_dim = z.shape
    h_dim = h.shape[1]
    w_zh, b_zh, w_hh, b_hh, w_mu, b_mu, w_var, b_var = _fold_step_params(params)
    n_flow = w_zh.shape[0]
    n_hidden = w_hh.shape[1]

    # Biases as (.., dim, 1) columns: feature on sublanes, broadcast over lanes.
    b_zh_c = b_zh.reshape(n_flow, h_dim, 1)
    b_hh_c = b_hh.reshape(n_flow, n_hidden, h_dim, 1)
    b_mu_c = b_mu.reshape(n_flow, z_dim, 1)
    b_var_c = b_var.reshape(n_flow, z_dim, 1)

    # Batch-on-lanes layout.
    zT = z.T      # (Zd, B)
    hT = h.T      # (Hd, B)

    # Batch tiling: lane blocks must be multiples of 128 or the full batch.
    if B > batch_tile:
        tb = batch_tile
    elif B >= 256 and (B // 2) % 128 == 0:
        tb = B // 2        # >= 2 grid steps so both v7x TensorCores get work
    else:
        tb = B
    grid = (pl.cdiv(B, tb),)

    col_map = lambda b: (0, b)
    full3 = lambda b: (0, 0, 0)
    full4 = lambda b: (0, 0, 0, 0)

    flops = 2 * n_flow * B * (h_dim * z_dim + n_hidden * h_dim * h_dim
                              + 2 * z_dim * h_dim)
    flops += n_flow * B * (6 * h_dim + 12 * z_dim)
    transcendentals = n_flow * B * ((1 + n_hidden) * h_dim + 3 * z_dim)
    param_bytes = 4 * sum(int(p.size) for p in
                          (w_zh, b_zh, w_hh, b_hh, w_mu, b_mu, w_var, b_var))
    bytes_accessed = 4 * (2 * B * z_dim + B * h_dim + B) + param_bytes

    z_out_t, logdet2d = pl.pallas_call(
        _iaf_kernel,
        out_shape=(
            jax.ShapeDtypeStruct((z_dim, B), z.dtype),
            jax.ShapeDtypeStruct((1, B), jnp.float32),   # logdet kept in f32
        ),
        grid=grid,
        in_specs=[
            pl.BlockSpec((z_dim, tb), col_map),
            pl.BlockSpec((h_dim, tb), col_map),
            pl.BlockSpec((n_flow, h_dim, z_dim), full3),
            pl.BlockSpec((n_flow, h_dim, 1), full3),
            pl.BlockSpec((n_flow, n_hidden, h_dim, h_dim), full4),
            pl.BlockSpec((n_flow, n_hidden, h_dim, 1), full4),
            pl.BlockSpec((n_flow, z_dim, h_dim), full3),
            pl.BlockSpec((n_flow, z_dim, 1), full3),
            pl.BlockSpec((n_flow, z_dim, h_dim), full3),
            pl.BlockSpec((n_flow, z_dim, 1), full3),
        ],
        out_specs=(
            pl.BlockSpec((z_dim, tb), col_map),
            pl.BlockSpec((1, tb), col_map),
        ),
        compiler_params=pltpu.CompilerParams(
            dimension_semantics=("parallel",),
        ),
        cost_estimate=pl.CostEstimate(
            flops=int(flops),
            transcendentals=int(transcendentals),
            bytes_accessed=int(bytes_accessed),
        ),
    )(zT, hT, w_zh, b_zh_c, w_hh, b_hh_c, w_mu, b_mu_c, w_var, b_var_c)

    return z_out_t.T, logdet2d.reshape((B,))


def _iaf_ref(z, h, params):
    """Pure-JAX reference with the original (unfolded) semantics."""
    w_zh, b_zh, w_hh, b_hh, w_mu, b_mu, w_var, b_var = params
    n_flow = w_zh.shape[0]
    n_hidden = w_hh.shape[1]
    hp = lax.Precision.HIGHEST
    logdet = jnp.zeros((z.shape[0],), jnp.float32)
    for i in range(n_flow):
        zc = z[:, ::-1] if i % 2 == 0 else z
        hh = _elu(jnp.dot(zc, jnp.tril(w_zh[i]).T, precision=hp) + b_zh[i]) + h
        for d in range(n_hidden):
            hh = _elu(jnp.dot(hh, jnp.tril(w_hh[i, d]).T, precision=hp) + b_hh[i, d])
        mu = jnp.dot(hh, jnp.tril(w_mu[i], -1).T, precision=hp) + b_mu[i]
        var = jax.nn.sigmoid(jnp.dot(hh, jnp.tril(w_var[i], -1).T, precision=hp) + b_var[i])
        zn = var * zc + (1.0 - var) * mu
        logdet = logdet + jnp.sum(jnp.log(var), axis=1)
        z = zn[:, ::-1] if i % 2 == 0 else zn
    return z, logdet


if __name__ == "__main__":
    key = jax.random.PRNGKey(0)
    B, z_dim, h_dim = 2, 8, 32          # batch=2, latent=8, hidden=32
    n_flow, n_hidden = 2, 1             # flow_depth=2, hidden_depth=1 (defaults)
    ks = jax.random.split(key, 12)

    z = jax.random.normal(ks[0], (B, z_dim), jnp.float32)
    h = jax.random.normal(ks[1], (B, h_dim), jnp.float32)
    s = 0.3
    w_zh = s * jax.random.normal(ks[2], (n_flow, h_dim, z_dim), jnp.float32)
    b_zh = 0.1 * jax.random.normal(ks[3], (n_flow, h_dim), jnp.float32)
    w_hh = s * jax.random.normal(ks[4], (n_flow, n_hidden, h_dim, h_dim), jnp.float32)
    b_hh = 0.1 * jax.random.normal(ks[5], (n_flow, n_hidden, h_dim), jnp.float32)
    w_mu = s * jax.random.normal(ks[6], (n_flow, z_dim, h_dim), jnp.float32)
    b_mu = 0.1 * jax.random.normal(ks[7], (n_flow, z_dim), jnp.float32)
    w_var = s * jax.random.normal(ks[8], (n_flow, z_dim, h_dim), jnp.float32)
    b_var = 0.1 * jax.random.normal(ks[9], (n_flow, z_dim), jnp.float32)
    params = (w_zh, b_zh, w_hh, b_hh, w_mu, b_mu, w_var, b_var)

    # --- small-batch path (single full-batch block) ---
    z_out, logdet = iaf_forward(z, h, params)
    jax.block_until_ready(z_out)
    jax.block_until_ready(logdet)

    z_ref, ld_ref = _iaf_ref(z, h, params)
    assert z_out.shape == z.shape and z_out.dtype == z.dtype
    assert logdet.shape == (B,) and logdet.dtype == jnp.float32
    assert bool(jnp.all(jnp.isfinite(z_out))) and bool(jnp.all(jnp.isfinite(logdet)))
    assert bool(jnp.allclose(z_out, z_ref, atol=5e-3, rtol=5e-3))
    assert bool(jnp.allclose(logdet, ld_ref, atol=5e-3, rtol=5e-3))

    # --- lane-dense multi-tile path (B=256 -> two 128-wide lane blocks) ---
    B2 = 256
    z2 = jax.random.normal(ks[10], (B2, z_dim), jnp.float32)
    h2 = jax.random.normal(ks[11], (B2, h_dim), jnp.float32)
    z_out2, logdet2 = iaf_forward(z2, h2, params)
    jax.block_until_ready(z_out2)
    z_ref2, ld_ref2 = _iaf_ref(z2, h2, params)
    assert bool(jnp.allclose(z_out2, z_ref2, atol=5e-3, rtol=5e-3))
    assert bool(jnp.allclose(logdet2, ld_ref2, atol=5e-3, rtol=5e-3))

    # TODO(synk): scale=False variant (z = z + mu, logdet = 0.0 scalar) not
    # implemented; only the default scale=True path is covered by this kernel.
    print("KERNEL_OK")
</pallas_src>

<mosaic_0001>
module attributes {stable_mosaic.version = 11 : i64} {
  func.func @_iaf_kernel(%arg0: i32, %arg1: memref<8x2xf32, #tpu.memory_space<vmem>>, %arg2: memref<32x2xf32, #tpu.memory_space<vmem>>, %arg3: memref<2x32x8xf32, #tpu.memory_space<vmem>>, %arg4: memref<2x32x1xf32, #tpu.memory_space<vmem>>, %arg5: memref<2x1x32x32xf32, #tpu.memory_space<vmem>>, %arg6: memref<2x1x32x1xf32, #tpu.memory_space<vmem>>, %arg7: memref<2x8x32xf32, #tpu.memory_space<vmem>>, %arg8: memref<2x8x1xf32, #tpu.memory_space<vmem>>, %arg9: memref<2x8x32xf32, #tpu.memory_space<vmem>>, %arg10: memref<2x8x1xf32, #tpu.memory_space<vmem>>, %arg11: memref<8x2xf32, #tpu.memory_space<vmem>>, %arg12: memref<1x2xf32, #tpu.memory_space<vmem>>) attributes {dimension_semantics = [#tpu.dimension_semantics<parallel>], iteration_bounds = array<i64: 1>, scalar_prefetch = 0 : i64, scratch_operands = 0 : i64, tpu.core_type = #tpu.core_type<tc>, window_params = [{transform_indices = @transform_0, window_bounds = array<i64: 8, 2>}, {transform_indices = @transform_1, window_bounds = array<i64: 32, 2>}, {pipeline_mode = #tpu.pipeline_mode<synchronous>, transform_indices = @transform_2, window_bounds = array<i64: 2, 32, 8>}, {pipeline_mode = #tpu.pipeline_mode<synchronous>, transform_indices = @transform_3, window_bounds = array<i64: 2, 32, 1>}, {pipeline_mode = #tpu.pipeline_mode<synchronous>, transform_indices = @transform_4, window_bounds = array<i64: 2, 1, 32, 32>}, {pipeline_mode = #tpu.pipeline_mode<synchronous>, transform_indices = @transform_5, window_bounds = array<i64: 2, 1, 32, 1>}, {pipeline_mode = #tpu.pipeline_mode<synchronous>, transform_indices = @transform_6, window_bounds = array<i64: 2, 8, 32>}, {pipeline_mode = #tpu.pipeline_mode<synchronous>, transform_indices = @transform_7, window_bounds = array<i64: 2, 8, 1>}, {pipeline_mode = #tpu.pipeline_mode<synchronous>, transform_indices = @transform_8, window_bounds = array<i64: 2, 8, 32>}, {pipeline_mode = #tpu.pipeline_mode<synchronous>, transform_indices = @transform_9, window_bounds = array<i64: 2, 8, 1>}, {transform_indices = @transform_10, window_bounds = array<i64: 8, 2>}, {transform_indices = @transform_11, window_bounds = array<i64: 1, 2>}]} {
    %c0 = arith.constant 0 : index
    %c0_0 = arith.constant 0 : index
    %0 = vector.load %arg1[%c0, %c0_0] : memref<8x2xf32, #tpu.memory_space<vmem>>, vector<8x2xf32>
    %c0_1 = arith.constant 0 : index
    %c0_2 = arith.constant 0 : index
    %1 = vector.load %arg2[%c0_1, %c0_2] : memref<32x2xf32, #tpu.memory_space<vmem>>, vector<32x2xf32>
    %cst = arith.constant 0.000000e+00 : f32
    %2 = vector.broadcast %cst : f32 to vector<1x2xf32>
    %c0_3 = arith.constant 0 : index
    %c0_4 = arith.constant 0 : index
    %c0_5 = arith.constant 0 : index
    %3 = vector.load %arg3[%c0_3, %c0_4, %c0_5] : memref<2x32x8xf32, #tpu.memory_space<vmem>>, vector<1x32x8xf32>
    %4 = vector.shape_cast %3 : vector<1x32x8xf32> to vector<32x8xf32>
    %c0_6 = arith.constant 0 : index
    %c0_7 = arith.constant 0 : index
    %c0_8 = arith.constant 0 : index
    %5 = vector.load %arg4[%c0_6, %c0_7, %c0_8] : memref<2x32x1xf32, #tpu.memory_space<vmem>>, vector<1x32x1xf32>
    %6 = vector.shape_cast %5 : vector<1x32x1xf32> to vector<32x1xf32>
    %7 = vector.shape_cast %6 : vector<32x1xf32> to vector<32x1xf32>
    %8 = vector.broadcast %7 : vector<32x1xf32> to vector<32x2xf32>
    %9 = vector.extract_strided_slice %4 {offsets = [0, 0], sizes = [32, 1], strides = [1, 1]} : vector<32x8xf32> to vector<32x1xf32>
    %10 = vector.extract_strided_slice %0 {offsets = [0, 0], sizes = [1, 2], strides = [1, 1]} : vector<8x2xf32> to vector<1x2xf32>
    %11 = vector.broadcast %9 : vector<32x1xf32> to vector<32x2xf32>
    %12 = vector.broadcast %10 : vector<1x2xf32> to vector<32x2xf32>
    %13 = arith.mulf %11, %12 : vector<32x2xf32>
    %14 = arith.addf %8, %13 : vector<32x2xf32>
    %15 = vector.extract_strided_slice %4 {offsets = [0, 1], sizes = [32, 1], strides = [1, 1]} : vector<32x8xf32> to vector<32x1xf32>
    %16 = vector.extract_strided_slice %0 {offsets = [1, 0], sizes = [1, 2], strides = [1, 1]} : vector<8x2xf32> to vector<1x2xf32>
    %17 = vector.broadcast %15 : vector<32x1xf32> to vector<32x2xf32>
    %18 = vector.broadcast %16 : vector<1x2xf32> to vector<32x2xf32>
    %19 = arith.mulf %17, %18 : vector<32x2xf32>
    %20 = arith.addf %14, %19 : vector<32x2xf32>
    %21 = vector.extract_strided_slice %4 {offsets = [0, 2], sizes = [32, 1], strides = [1, 1]} : vector<32x8xf32> to vector<32x1xf32>
    %22 = vector.extract_strided_slice %0 {offsets = [2, 0], sizes = [1, 2], strides = [1, 1]} : vector<8x2xf32> to vector<1x2xf32>
    %23 = vector.broadcast %21 : vector<32x1xf32> to vector<32x2xf32>
    %24 = vector.broadcast %22 : vector<1x2xf32> to vector<32x2xf32>
    %25 = arith.mulf %23, %24 : vector<32x2xf32>
    %26 = arith.addf %20, %25 : vector<32x2xf32>
    %27 = vector.extract_strided_slice %4 {offsets = [0, 3], sizes = [32, 1], strides = [1, 1]} : vector<32x8xf32> to vector<32x1xf32>
    %28 = vector.extract_strided_slice %0 {offsets = [3, 0], sizes = [1, 2], strides = [1, 1]} : vector<8x2xf32> to vector<1x2xf32>
    %29 = vector.broadcast %27 : vector<32x1xf32> to vector<32x2xf32>
    %30 = vector.broadcast %28 : vector<1x2xf32> to vector<32x2xf32>
    %31 = arith.mulf %29, %30 : vector<32x2xf32>
    %32 = arith.addf %26, %31 : vector<32x2xf32>
    %33 = vector.extract_strided_slice %4 {offsets = [0, 4], sizes = [32, 1], strides = [1, 1]} : vector<32x8xf32> to vector<32x1xf32>
    %34 = vector.extract_strided_slice %0 {offsets = [4, 0], sizes = [1, 2], strides = [1, 1]} : vector<8x2xf32> to vector<1x2xf32>
    %35 = vector.broadcast %33 : vector<32x1xf32> to vector<32x2xf32>
    %36 = vector.broadcast %34 : vector<1x2xf32> to vector<32x2xf32>
    %37 = arith.mulf %35, %36 : vector<32x2xf32>
    %38 = arith.addf %32, %37 : vector<32x2xf32>
    %39 = vector.extract_strided_slice %4 {offsets = [0, 5], sizes = [32, 1], strides = [1, 1]} : vector<32x8xf32> to vector<32x1xf32>
    %40 = vector.extract_strided_slice %0 {offsets = [5, 0], sizes = [1, 2], strides = [1, 1]} : vector<8x2xf32> to vector<1x2xf32>
    %41 = vector.broadcast %39 : vector<32x1xf32> to vector<32x2xf32>
    %42 = vector.broadcast %40 : vector<1x2xf32> to vector<32x2xf32>
    %43 = arith.mulf %41, %42 : vector<32x2xf32>
    %44 = arith.addf %38, %43 : vector<32x2xf32>
    %45 = vector.extract_strided_slice %4 {offsets = [0, 6], sizes = [32, 1], strides = [1, 1]} : vector<32x8xf32> to vector<32x1xf32>
    %46 = vector.extract_strided_slice %0 {offsets = [6, 0], sizes = [1, 2], strides = [1, 1]} : vector<8x2xf32> to vector<1x2xf32>
    %47 = vector.broadcast %45 : vector<32x1xf32> to vector<32x2xf32>
    %48 = vector.broadcast %46 : vector<1x2xf32> to vector<32x2xf32>
    %49 = arith.mulf %47, %48 : vector<32x2xf32>
    %50 = arith.addf %44, %49 : vector<32x2xf32>
    %51 = vector.extract_strided_slice %4 {offsets = [0, 7], sizes = [32, 1], strides = [1, 1]} : vector<32x8xf32> to vector<32x1xf32>
    %52 = vector.extract_strided_slice %0 {offsets = [7, 0], sizes = [1, 2], strides = [1, 1]} : vector<8x2xf32> to vector<1x2xf32>
    %53 = vector.broadcast %51 : vector<32x1xf32> to vector<32x2xf32>
    %54 = vector.broadcast %52 : vector<1x2xf32> to vector<32x2xf32>
    %55 = arith.mulf %53, %54 : vector<32x2xf32>
    %56 = arith.addf %50, %55 : vector<32x2xf32>
    %cst_9 = arith.constant 0.000000e+00 : f32
    %57 = vector.broadcast %cst_9 : f32 to vector<32x2xf32>
    %58 = arith.cmpf ogt, %56, %57 : vector<32x2xf32>
    %cst_10 = arith.constant 0.000000e+00 : f32
    %59 = vector.broadcast %cst_10 : f32 to vector<32x2xf32>
    %60 = arith.minimumf %56, %59 : vector<32x2xf32>
    %61 = math.exp %60 : vector<32x2xf32>
    %cst_11 = arith.constant 1.000000e+00 : f32
    %62 = vector.broadcast %cst_11 : f32 to vector<32x2xf32>
    %63 = arith.subf %61, %62 : vector<32x2xf32>
    %64 = arith.select %58, %56, %63 : vector<32x2xi1>, vector<32x2xf32>
    %65 = arith.addf %64, %1 : vector<32x2xf32>
    %c0_12 = arith.constant 0 : index
    %c0_13 = arith.constant 0 : index
    %c0_14 = arith.constant 0 : index
    %c0_15 = arith.constant 0 : index
    %66 = vector.load %arg5[%c0_12, %c0_13, %c0_14, %c0_15] : memref<2x1x32x32xf32, #tpu.memory_space<vmem>>, vector<1x1x32x32xf32>
    %67 = vector.shape_cast %66 : vector<1x1x32x32xf32> to vector<32x32xf32>
    %c0_16 = arith.constant 0 : index
    %c0_17 = arith.constant 0 : index
    %c0_18 = arith.constant 0 : index
    %c0_19 = arith.constant 0 : index
    %68 = vector.load %arg6[%c0_16, %c0_17, %c0_18, %c0_19] : memref<2x1x32x1xf32, #tpu.memory_space<vmem>>, vector<1x1x32x1xf32>
    %69 = vector.shape_cast %68 : vector<1x1x32x1xf32> to vector<32x1xf32>
    %cst_20 = arith.constant dense<0.000000e+00> : vector<32x2xf32>
    %70 = tpu.matmul %67, %65, %cst_20 {dimension_numbers = #tpu.dot_dimension_numbers<[1], [0], [0], [1], [0, 0, 1, 1], [], []>} : vector<32x32xf32>, vector<32x2xf32>, vector<32x2xf32> -> vector<32x2xf32>
    %71 = vector.broadcast %69 : vector<32x1xf32> to vector<32x2xf32>
    %72 = arith.addf %70, %71 : vector<32x2xf32>
    %cst_21 = arith.constant 0.000000e+00 : f32
    %73 = vector.broadcast %cst_21 : f32 to vector<32x2xf32>
    %74 = arith.cmpf ogt, %72, %73 : vector<32x2xf32>
    %cst_22 = arith.constant 0.000000e+00 : f32
    %75 = vector.broadcast %cst_22 : f32 to vector<32x2xf32>
    %76 = arith.minimumf %72, %75 : vector<32x2xf32>
    %77 = math.exp %76 : vector<32x2xf32>
    %cst_23 = arith.constant 1.000000e+00 : f32
    %78 = vector.broadcast %cst_23 : f32 to vector<32x2xf32>
    %79 = arith.subf %77, %78 : vector<32x2xf32>
    %80 = arith.select %74, %72, %79 : vector<32x2xi1>, vector<32x2xf32>
    %c0_24 = arith.constant 0 : index
    %c0_25 = arith.constant 0 : index
    %c0_26 = arith.constant 0 : index
    %81 = vector.load %arg7[%c0_24, %c0_25, %c0_26] : memref<2x8x32xf32, #tpu.memory_space<vmem>>, vector<1x8x32xf32>
    %82 = vector.shape_cast %81 : vector<1x8x32xf32> to vector<8x32xf32>
    %c0_27 = arith.constant 0 : index
    %c0_28 = arith.constant 0 : index
    %c0_29 = arith.constant 0 : index
    %83 = vector.load %arg8[%c0_27, %c0_28, %c0_29] : memref<2x8x1xf32, #tpu.memory_space<vmem>>, vector<1x8x1xf32>
    %84 = vector.shape_cast %83 : vector<1x8x1xf32> to vector<8x1xf32>
    %cst_30 = arith.constant dense<0.000000e+00> : vector<8x2xf32>
    %85 = tpu.matmul %82, %80, %cst_30 {dimension_numbers = #tpu.dot_dimension_numbers<[1], [0], [0], [1], [0, 0, 1, 1], [], []>} : vector<8x32xf32>, vector<32x2xf32>, vector<8x2xf32> -> vector<8x2xf32>
    %86 = vector.broadcast %84 : vector<8x1xf32> to vector<8x2xf32>
    %87 = arith.addf %85, %86 : vector<8x2xf32>
    %c0_31 = arith.constant 0 : index
    %c0_32 = arith.constant 0 : index
    %c0_33 = arith.constant 0 : index
    %88 = vector.load %arg9[%c0_31, %c0_32, %c0_33] : memref<2x8x32xf32, #tpu.memory_space<vmem>>, vector<1x8x32xf32>
    %89 = vector.shape_cast %88 : vector<1x8x32xf32> to vector<8x32xf32>
    %c0_34 = arith.constant 0 : index
    %c0_35 = arith.constant 0 : index
    %c0_36 = arith.constant 0 : index
    %90 = vector.load %arg10[%c0_34, %c0_35, %c0_36] : memref<2x8x1xf32, #tpu.memory_space<vmem>>, vector<1x8x1xf32>
    %91 = vector.shape_cast %90 : vector<1x8x1xf32> to vector<8x1xf32>
    %cst_37 = arith.constant dense<0.000000e+00> : vector<8x2xf32>
    %92 = tpu.matmul %89, %80, %cst_37 {dimension_numbers = #tpu.dot_dimension_numbers<[1], [0], [0], [1], [0, 0, 1, 1], [], []>} : vector<8x32xf32>, vector<32x2xf32>, vector<8x2xf32> -> vector<8x2xf32>
    %93 = vector.broadcast %91 : vector<8x1xf32> to vector<8x2xf32>
    %94 = arith.addf %92, %93 : vector<8x2xf32>
    %95 = math.absf %94 : vector<8x2xf32>
    %cst_38 = arith.constant 0.000000e+00 : f32
    %96 = vector.broadcast %cst_38 : f32 to vector<8x2xf32>
    %97 = arith.subf %96, %95 : vector<8x2xf32>
    %98 = math.exp %97 : vector<8x2xf32>
    %cst_39 = arith.constant 1.000000e+00 : f32
    %99 = vector.broadcast %cst_39 : f32 to vector<8x2xf32>
    %100 = arith.addf %99, %98 : vector<8x2xf32>
    %cst_40 = arith.constant 0.000000e+00 : f32
    %101 = vector.broadcast %cst_40 : f32 to vector<8x2xf32>
    %102 = arith.cmpf oge, %94, %101 : vector<8x2xf32>
    %cst_41 = arith.constant 1.000000e+00 : f32
    %103 = vector.broadcast %cst_41 : f32 to vector<8x2xf32>
    %104 = arith.select %102, %103, %98 : vector<8x2xi1>, vector<8x2xf32>
    %105 = arith.divf %104, %100 : vector<8x2xf32>
    %cst_42 = arith.constant 0.000000e+00 : f32
    %106 = vector.broadcast %cst_42 : f32 to vector<8x2xf32>
    %107 = arith.minimumf %94, %106 : vector<8x2xf32>
    %108 = math.log %100 : vector<8x2xf32>
    %109 = arith.subf %107, %108 : vector<8x2xf32>
    %110 = arith.subf %0, %87 : vector<8x2xf32>
    %111 = arith.mulf %105, %110 : vector<8x2xf32>
    %112 = arith.addf %87, %111 : vector<8x2xf32>
    %cst_43 = arith.constant dense<0.000000e+00> : vector<2xf32>
    %113 = vector.multi_reduction <add>, %109, %cst_43 [0] : vector<8x2xf32> to vector<2xf32>
    %114 = vector.shape_cast %113 : vector<2xf32> to vector<1x2xf32>
    %115 = arith.addf %2, %114 : vector<1x2xf32>
    %c1 = arith.constant 1 : index
    %c0_44 = arith.constant 0 : index
    %c0_45 = arith.constant 0 : index
    %116 = vector.load %arg3[%c1, %c0_44, %c0_45] : memref<2x32x8xf32, #tpu.memory_space<vmem>>, vector<1x32x8xf32>
    %117 = vector.shape_cast %116 : vector<1x32x8xf32> to vector<32x8xf32>
    %c1_46 = arith.constant 1 : index
    %c0_47 = arith.constant 0 : index
    %c0_48 = arith.constant 0 : index
    %118 = vector.load %arg4[%c1_46, %c0_47, %c0_48] : memref<2x32x1xf32, #tpu.memory_space<vmem>>, vector<1x32x1xf32>
    %119 = vector.shape_cast %118 : vector<1x32x1xf32> to vector<32x1xf32>
    %120 = vector.shape_cast %119 : vector<32x1xf32> to vector<32x1xf32>
    %121 = vector.broadcast %120 : vector<32x1xf32> to vector<32x2xf32>
    %122 = vector.extract_strided_slice %117 {offsets = [0, 0], sizes = [32, 1], strides = [1, 1]} : vector<32x8xf32> to vector<32x1xf32>
    %123 = vector.extract_strided_slice %112 {offsets = [0, 0], sizes = [1, 2], strides = [1, 1]} : vector<8x2xf32> to vector<1x2xf32>
    %124 = vector.broadcast %122 : vector<32x1xf32> to vector<32x2xf32>
    %125 = vector.broadcast %123 : vector<1x2xf32> to vector<32x2xf32>
    %126 = arith.mulf %124, %125 : vector<32x2xf32>
    %127 = arith.addf %121, %126 : vector<32x2xf32>
    %128 = vector.extract_strided_slice %117 {offsets = [0, 1], sizes = [32, 1], strides = [1, 1]} : vector<32x8xf32> to vector<32x1xf32>
    %129 = vector.extract_strided_slice %112 {offsets = [1, 0], sizes = [1, 2], strides = [1, 1]} : vector<8x2xf32> to vector<1x2xf32>
    %130 = vector.broadcast %128 : vector<32x1xf32> to vector<32x2xf32>
    %131 = vector.broadcast %129 : vector<1x2xf32> to vector<32x2xf32>
    %132 = arith.mulf %130, %131 : vector<32x2xf32>
    %133 = arith.addf %127, %132 : vector<32x2xf32>
    %134 = vector.extract_strided_slice %117 {offsets = [0, 2], sizes = [32, 1], strides = [1, 1]} : vector<32x8xf32> to vector<32x1xf32>
    %135 = vector.extract_strided_slice %112 {offsets = [2, 0], sizes = [1, 2], strides = [1, 1]} : vector<8x2xf32> to vector<1x2xf32>
    %136 = vector.broadcast %134 : vector<32x1xf32> to vector<32x2xf32>
    %137 = vector.broadcast %135 : vector<1x2xf32> to vector<32x2xf32>
    %138 = arith.mulf %136, %137 : vector<32x2xf32>
    %139 = arith.addf %133, %138 : vector<32x2xf32>
    %140 = vector.extract_strided_slice %117 {offsets = [0, 3], sizes = [32, 1], strides = [1, 1]} : vector<32x8xf32> to vector<32x1xf32>
    %141 = vector.extract_strided_slice %112 {offsets = [3, 0], sizes = [1, 2], strides = [1, 1]} : vector<8x2xf32> to vector<1x2xf32>
    %142 = vector.broadcast %140 : vector<32x1xf32> to vector<32x2xf32>
    %143 = vector.broadcast %141 : vector<1x2xf32> to vector<32x2xf32>
    %144 = arith.mulf %142, %143 : vector<32x2xf32>
    %145 = arith.addf %139, %144 : vector<32x2xf32>
    %146 = vector.extract_strided_slice %117 {offsets = [0, 4], sizes = [32, 1], strides = [1, 1]} : vector<32x8xf32> to vector<32x1xf32>
    %147 = vector.extract_strided_slice %112 {offsets = [4, 0], sizes = [1, 2], strides = [1, 1]} : vector<8x2xf32> to vector<1x2xf32>
    %148 = vector.broadcast %146 : vector<32x1xf32> to vector<32x2xf32>
    %149 = vector.broadcast %147 : vector<1x2xf32> to vector<32x2xf32>
    %150 = arith.mulf %148, %149 : vector<32x2xf32>
    %151 = arith.addf %145, %150 : vector<32x2xf32>
    %152 = vector.extract_strided_slice %117 {offsets = [0, 5], sizes = [32, 1], strides = [1, 1]} : vector<32x8xf32> to vector<32x1xf32>
    %153 = vector.extract_strided_slice %112 {offsets = [5, 0], sizes = [1, 2], strides = [1, 1]} : vector<8x2xf32> to vector<1x2xf32>
    %154 = vector.broadcast %152 : vector<32x1xf32> to vector<32x2xf32>
    %155 = vector.broadcast %153 : vector<1x2xf32> to vector<32x2xf32>
    %156 = arith.mulf %154, %155 : vector<32x2xf32>
    %157 = arith.addf %151, %156 : vector<32x2xf32>
    %158 = vector.extract_strided_slice %117 {offsets = [0, 6], sizes = [32, 1], strides = [1, 1]} : vector<32x8xf32> to vector<32x1xf32>
    %159 = vector.extract_strided_slice %112 {offsets = [6, 0], sizes = [1, 2], strides = [1, 1]} : vector<8x2xf32> to vector<1x2xf32>
    %160 = vector.broadcast %158 : vector<32x1xf32> to vector<32x2xf32>
    %161 = vector.broadcast %159 : vector<1x2xf32> to vector<32x2xf32>
    %162 = arith.mulf %160, %161 : vector<32x2xf32>
    %163 = arith.addf %157, %162 : vector<32x2xf32>
    %164 = vector.extract_strided_slice %117 {offsets = [0, 7], sizes = [32, 1], strides = [1, 1]} : vector<32x8xf32> to vector<32x1xf32>
    %165 = vector.extract_strided_slice %112 {offsets = [7, 0], sizes = [1, 2], strides = [1, 1]} : vector<8x2xf32> to vector<1x2xf32>
    %166 = vector.broadcast %164 : vector<32x1xf32> to vector<32x2xf32>
    %167 = vector.broadcast %165 : vector<1x2xf32> to vector<32x2xf32>
    %168 = arith.mulf %166, %167 : vector<32x2xf32>
    %169 = arith.addf %163, %168 : vector<32x2xf32>
    %cst_49 = arith.constant 0.000000e+00 : f32
    %170 = vector.broadcast %cst_49 : f32 to vector<32x2xf32>
    %171 = arith.cmpf ogt, %169, %170 : vector<32x2xf32>
    %cst_50 = arith.constant 0.000000e+00 : f32
    %172 = vector.broadcast %cst_50 : f32 to vector<32x2xf32>
    %173 = arith.minimumf %169, %172 : vector<32x2xf32>
    %174 = math.exp %173 : vector<32x2xf32>
    %cst_51 = arith.constant 1.000000e+00 : f32
    %175 = vector.broadcast %cst_51 : f32 to vector<32x2xf32>
    %176 = arith.subf %174, %175 : vector<32x2xf32>
    %177 = arith.select %171, %169, %176 : vector<32x2xi1>, vector<32x2xf32>
    %178 = arith.addf %177, %1 : vector<32x2xf32>
    %c1_52 = arith.constant 1 : index
    %c0_53 = arith.constant 0 : index
    %c0_54 = arith.constant 0 : index
    %c0_55 = arith.constant 0 : index
    %179 = vector.load %arg5[%c1_52, %c0_53, %c0_54, %c0_55] : memref<2x1x32x32xf32, #tpu.memory_space<vmem>>, vector<1x1x32x32xf32>
    %180 = vector.shape_cast %179 : vector<1x1x32x32xf32> to vector<32x32xf32>
    %c1_56 = arith.constant 1 : index
    %c0_57 = arith.constant 0 : index
    %c0_58 = arith.constant 0 : index
    %c0_59 = arith.constant 0 : index
    %181 = vector.load %arg6[%c1_56, %c0_57, %c0_58, %c0_59] : memref<2x1x32x1xf32, #tpu.memory_space<vmem>>, vector<1x1x32x1xf32>
    %182 = vector.shape_cast %181 : vector<1x1x32x1xf32> to vector<32x1xf32>
    %cst_60 = arith.constant dense<0.000000e+00> : vector<32x2xf32>
    %183 = tpu.matmul %180, %178, %cst_60 {dimension_numbers = #tpu.dot_dimension_numbers<[1], [0], [0], [1], [0, 0, 1, 1], [], []>} : vector<32x32xf32>, vector<32x2xf32>, vector<32x2xf32> -> vector<32x2xf32>
    %184 = vector.broadcast %182 : vector<32x1xf32> to vector<32x2xf32>
    %185 = arith.addf %183, %184 : vector<32x2xf32>
    %cst_61 = arith.constant 0.000000e+00 : f32
    %186 = vector.broadcast %cst_61 : f32 to vector<32x2xf32>
    %187 = arith.cmpf ogt, %185, %186 : vector<32x2xf32>
    %cst_62 = arith.constant 0.000000e+00 : f32
    %188 = vector.broadcast %cst_62 : f32 to vector<32x2xf32>
    %189 = arith.minimumf %185, %188 : vector<32x2xf32>
    %190 = math.exp %189 : vector<32x2xf32>
    %cst_63 = arith.constant 1.000000e+00 : f32
    %191 = vector.broadcast %cst_63 : f32 to vector<32x2xf32>
    %192 = arith.subf %190, %191 : vector<32x2xf32>
    %193 = arith.select %187, %185, %192 : vector<32x2xi1>, vector<32x2xf32>
    %c1_64 = arith.constant 1 : index
    %c0_65 = arith.constant 0 : index
    %c0_66 = arith.constant 0 : index
    %194 = vector.load %arg7[%c1_64, %c0_65, %c0_66] : memref<2x8x32xf32, #tpu.memory_space<vmem>>, vector<1x8x32xf32>
    %195 = vector.shape_cast %194 : vector<1x8x32xf32> to vector<8x32xf32>
    %c1_67 = arith.constant 1 : index
    %c0_68 = arith.constant 0 : index
    %c0_69 = arith.constant 0 : index
    %196 = vector.load %arg8[%c1_67, %c0_68, %c0_69] : memref<2x8x1xf32, #tpu.memory_space<vmem>>, vector<1x8x1xf32>
    %197 = vector.shape_cast %196 : vector<1x8x1xf32> to vector<8x1xf32>
    %cst_70 = arith.constant dense<0.000000e+00> : vector<8x2xf32>
    %198 = tpu.matmul %195, %193, %cst_70 {dimension_numbers = #tpu.dot_dimension_numbers<[1], [0], [0], [1], [0, 0, 1, 1], [], []>} : vector<8x32xf32>, vector<32x2xf32>, vector<8x2xf32> -> vector<8x2xf32>
    %199 = vector.broadcast %197 : vector<8x1xf32> to vector<8x2xf32>
    %200 = arith.addf %198, %199 : vector<8x2xf32>
    %c1_71 = arith.constant 1 : index
    %c0_72 = arith.constant 0 : index
    %c0_73 = arith.constant 0 : index
    %201 = vector.load %arg9[%c1_71, %c0_72, %c0_73] : memref<2x8x32xf32, #tpu.memory_space<vmem>>, vector<1x8x32xf32>
    %202 = vector.shape_cast %201 : vector<1x8x32xf32> to vector<8x32xf32>
    %c1_74 = arith.constant 1 : index
    %c0_75 = arith.constant 0 : index
    %c0_76 = arith.constant 0 : index
    %203 = vector.load %arg10[%c1_74, %c0_75, %c0_76] : memref<2x8x1xf32, #tpu.memory_space<vmem>>, vector<1x8x1xf32>
    %204 = vector.shape_cast %203 : vector<1x8x1xf32> to vector<8x1xf32>
    %cst_77 = arith.constant dense<0.000000e+00> : vector<8x2xf32>
    %205 = tpu.matmul %202, %193, %cst_77 {dimension_numbers = #tpu.dot_dimension_numbers<[1], [0], [0], [1], [0, 0, 1, 1], [], []>} : vector<8x32xf32>, vector<32x2xf32>, vector<8x2xf32> -> vector<8x2xf32>
    %206 = vector.broadcast %204 : vector<8x1xf32> to vector<8x2xf32>
    %207 = arith.addf %205, %206 : vector<8x2xf32>
    %208 = math.absf %207 : vector<8x2xf32>
    %cst_78 = arith.constant 0.000000e+00 : f32
    %209 = vector.broadcast %cst_78 : f32 to vector<8x2xf32>
    %210 = arith.subf %209, %208 : vector<8x2xf32>
    %211 = math.exp %210 : vector<8x2xf32>
    %cst_79 = arith.constant 1.000000e+00 : f32
    %212 = vector.broadcast %cst_79 : f32 to vector<8x2xf32>
    %213 = arith.addf %212, %211 : vector<8x2xf32>
    %cst_80 = arith.constant 0.000000e+00 : f32
    %214 = vector.broadcast %cst_80 : f32 to vector<8x2xf32>
    %215 = arith.cmpf oge, %207, %214 : vector<8x2xf32>
    %cst_81 = arith.constant 1.000000e+00 : f32
    %216 = vector.broadcast %cst_81 : f32 to vector<8x2xf32>
    %217 = arith.select %215, %216, %211 : vector<8x2xi1>, vector<8x2xf32>
    %218 = arith.divf %217, %213 : vector<8x2xf32>
    %cst_82 = arith.constant 0.000000e+00 : f32
    %219 = vector.broadcast %cst_82 : f32 to vector<8x2xf32>
    %220 = arith.minimumf %207, %219 : vector<8x2xf32>
    %221 = math.log %213 : vector<8x2xf32>
    %222 = arith.subf %220, %221 : vector<8x2xf32>
    %223 = arith.subf %112, %200 : vector<8x2xf32>
    %224 = arith.mulf %218, %223 : vector<8x2xf32>
    %225 = arith.addf %200, %224 : vector<8x2xf32>
    %cst_83 = arith.constant dense<0.000000e+00> : vector<2xf32>
    %226 = vector.multi_reduction <add>, %222, %cst_83 [0] : vector<8x2xf32> to vector<2xf32>
    %227 = vector.shape_cast %226 : vector<2xf32> to vector<1x2xf32>
    %228 = arith.addf %115, %227 : vector<1x2xf32>
    %c0_84 = arith.constant 0 : index
    %c0_85 = arith.constant 0 : index
    %229 = vector.load %arg11[%c0_84, %c0_85] : memref<8x2xf32, #tpu.memory_space<vmem>>, vector<8x2xf32>
    tpu.vector_store %arg11[%c0_84, %c0_85], %225 {strides = array<i32>} : memref<8x2xf32, #tpu.memory_space<vmem>>, vector<8x2xf32>,
    %c0_86 = arith.constant 0 : index
    %c0_87 = arith.constant 0 : index
    %230 = vector.load %arg12[%c0_86, %c0_87] : memref<1x2xf32, #tpu.memory_space<vmem>>, vector<1x2xf32>
    tpu.vector_store %arg12[%c0_86, %c0_87], %228 {strides = array<i32>} : memref<1x2xf32, #tpu.memory_space<vmem>>, vector<1x2xf32>,
    return
  }
  func.func @transform_0(%arg0: i32) -> (i32, i32) {
    %c0_i32 = arith.constant 0 : i32
    %c0_i32_0 = arith.constant 0 : i32
    return %c0_i32, %arg0 : i32, i32
  }
  func.func @transform_1(%arg0: i32) -> (i32, i32) {
    %c0_i32 = arith.constant 0 : i32
    %c0_i32_0 = arith.constant 0 : i32
    return %c0_i32, %arg0 : i32, i32
  }
  func.func @transform_2(%arg0: i32) -> (i32, i32, i32) {
    %c0_i32 = arith.constant 0 : i32
    %c0_i32_0 = arith.constant 0 : i32
    %c0_i32_1 = arith.constant 0 : i32
    %c0_i32_2 = arith.constant 0 : i32
    return %c0_i32, %c0_i32_0, %c0_i32_1 : i32, i32, i32
  }
  func.func @transform_3(%arg0: i32) -> (i32, i32, i32) {
    %c0_i32 = arith.constant 0 : i32
    %c0_i32_0 = arith.constant 0 : i32
    %c0_i32_1 = arith.constant 0 : i32
    %c0_i32_2 = arith.constant 0 : i32
    return %c0_i32, %c0_i32_0, %c0_i32_1 : i32, i32, i32
  }
  func.func @transform_4(%arg0: i32) -> (i32, i32, i32, i32) {
    %c0_i32 = arith.constant 0 : i32
    %c0_i32_0 = arith.constant 0 : i32
    %c0_i32_1 = arith.constant 0 : i32
    %c0_i32_2 = arith.constant 0 : i32
    %c0_i32_3 = arith.constant 0 : i32
    return %c0_i32, %c0_i32_0, %c0_i32_1, %c0_i32_2 : i32, i32, i32, i32
  }
  func.func @transform_5(%arg0: i32) -> (i32, i32, i32, i32) {
    %c0_i32 = arith.constant 0 : i32
    %c0_i32_0 = arith.constant 0 : i32
    %c0_i32_1 = arith.constant 0 : i32
    %c0_i32_2 = arith.constant 0 : i32
    %c0_i32_3 = arith.constant 0 : i32
    return %c0_i32, %c0_i32_0, %c0_i32_1, %c0_i32_2 : i32, i32, i32, i32
  }
  func.func @transform_6(%arg0: i32) -> (i32, i32, i32) {
    %c0_i32 = arith.constant 0 : i32
    %c0_i32_0 = arith.constant 0 : i32
    %c0_i32_1 = arith.constant 0 : i32
    %c0_i32_2 = arith.constant 0 : i32
    return %c0_i32, %c0_i32_0, %c0_i32_1 : i32, i32, i32
  }
  func.func @transform_7(%arg0: i32) -> (i32, i32, i32) {
    %c0_i32 = arith.constant 0 : i32
    %c0_i32_0 = arith.constant 0 : i32
    %c0_i32_1 = arith.constant 0 : i32
    %c0_i32_2 = arith.constant 0 : i32
    return %c0_i32, %c0_i32_0, %c0_i32_1 : i32, i32, i32
  }
  func.func @transform_8(%arg0: i32) -> (i32, i32, i32) {
    %c0_i32 = arith.constant 0 : i32
    %c0_i32_0 = arith.constant 0 : i32
    %c0_i32_1 = arith.constant 0 : i32
    %c0_i32_2 = arith.constant 0 : i32
    return %c0_i32, %c0_i32_0, %c0_i32_1 : i32, i32, i32
  }
  func.func @transform_9(%arg0: i32) -> (i32, i32, i32) {
    %c0_i32 = arith.constant 0 : i32
    %c0_i32_0 = arith.constant 0 : i32
    %c0_i32_1 = arith.constant 0 : i32
    %c0_i32_2 = arith.constant 0 : i32
    return %c0_i32, %c0_i32_0, %c0_i32_1 : i32, i32, i32
  }
  func.func @transform_10(%arg0: i32) -> (i32, i32) {
    %c0_i32 = arith.constant 0 : i32
    %c0_i32_0 = arith.constant 0 : i32
    return %c0_i32, %arg0 : i32, i32
  }
  func.func @transform_11(%arg0: i32) -> (i32, i32) {
    %c0_i32 = arith.constant 0 : i32
    %c0_i32_0 = arith.constant 0 : i32
    return %c0_i32, %arg0 : i32, i32
  }
}

</mosaic_0001>

<bundles_post_ra>
// kernel: tpu_custom_call.1
= control target key start
LH: loop header
LB: loop body
LE: loop exit
PB: predicated region body
PF: predicated region fallthrough
CT: control target
= control target key end

     0   :  { %v1595_v1 = vmov 1   ;;  %v1596_v2 = vmov 0   ;;  %s2124_s0 = inlined_call_operand.vmem [shape: f32[8,2], index: 0, kind: input, shape index: {}]   ;;  %s2125_s1 = inlined_call_operand.vmem [shape: f32[32,2], index: 1, kind: input, shape index: {}]   ;;  %s2126_s2 = inlined_call_operand.vmem [shape: f32[2,32,8], index: 2, kind: input, shape index: {}]   ;;  %s2127_s3 = inlined_call_operand.vmem [shape: f32[2,32,1], index: 3, kind: input, shape index: {}]   ;;  %s2128_s4 = inlined_call_operand.vmem [shape: f32[2,1,32,32], index: 4, kind: input, shape index: {}]   ;;  %s2129_s5 = inlined_call_operand.vmem [shape: f32[2,1,32,1], index: 5, kind: input, shape index: {}]   ;;  %s2130_s6 = inlined_call_operand.vmem [shape: f32[2,8,32], index: 6, kind: input, shape index: {}]   ;;  %s2131_s7 = inlined_call_operand.vmem [shape: f32[2,8,1], index: 7, kind: input, shape index: {}]   ;;  %s2132_s8 = inlined_call_operand.vmem [shape: f32[2,8,32], index: 8, kind: input, shape index: {}]   ;;  %s2133_s9 = inlined_call_operand.vmem [shape: f32[2,8,1], index: 9, kind: input, shape index: {}]   ;;  %s2134_s10 = inlined_call_operand.vmem [shape: f32[8,2], index: 10, kind: output, shape index: {0}]   ;;  %s2135_s11 = inlined_call_operand.hbm [shape: f32[1,2], index: 11, kind: output, shape index: {1}]  }
   0x1   :  { %v1669_v0 = vld [vmem:[%s2126_s2 + $0x10] sm:$0xff]  ;;  %1478 = vset.pattern.permute.xlu0 %v1595_v1  ;;  %1475 = vset.pattern.permute.xlu1 %v1596_v2 }
   0x2   :  { %112 = vperm.xlu0 %1478, %v1669_v0   ;;  %83 = vperm.xlu1 %1475, %v1669_v0  }
   0x3   :  { %17 = vsyncpa [#allocation3], 0  ;;  %v1678_v3 = vld [vmem:[%s2126_s2 + $0x18] sm:$0xff]  ;;  %v1690_v5 = vld [vmem:[%s2126_s2 + $0x8] sm:$0xff]  ;;  %v1597_v7 = vmov 2   ;;  %v1598_v10 = vmov 3   ;;  %v91_v46 = vlaneseq }
   0x4   :  { %v50_v4 = vld [vmem:[%s2127_s3 + $0x18] sm:$0xff]  ;;  %v49_v6 = vld [vmem:[%s2127_s3 + $0x10] sm:$0xff]  ;;  %v43_v8 = vld [vmem:[%s2126_s2] sm:$0xff]  ;;  %v1599_v12 = vmov 4   ;;  %v1600_v13 = vmov 5   ;;  %v1601_v14 = vmov 6  }
   0x5   :  { %v48_v9 = vld [vmem:[%s2127_s3 + $0x8] sm:$0xff]  ;;  %v47_v11 = vld [vmem:[%s2127_s3] sm:$0xff]  ;;  %v1602_v15 = vmov 7   ;;  %vm355_vm0 = vcmask 261120   ;;  %v333_v19 = vld [vmem:[%s2129_s5 + $0x10] sm:$0xff]  ;;  %v1824_v49 = vshrl.u32 %v91_v46, 7 }
   0x6   :  { %1479 = vset.pattern.permute.xlu0 %v1596_v2  ;;  %1476 = vset.pattern.permute.xlu1 %v1595_v1  ;;  %v327_v17 = vld [vmem:[%s2128_s4] sm:$0xff]  ;;  %v334_v21 = vld [vmem:[%s2129_s5 + $0x18] sm:$0xff]  ;;  %v332_v22 = vld [vmem:[%s2129_s5 + $0x8] sm:$0xff]  ;;  %vm1604_vm5 = vmmov 0  }
   0x7   :  { %88 = vperm.xlu0 %1479, %v1678_v3   ;;  %116 = vperm.xlu1 %1476, %v1678_v3   ;;  %v331_v23 = vld [vmem:[%s2129_s5] sm:$0xff]  ;;  %v1784_v28 = vld [vmem:[%s2126_s2 + $0x38] sm:$0xff]  ;;  %v1795_v32 = vld [vmem:[%s2126_s2 + $0x30] sm:$0xff]  ;;  %v93_v51 = vsub.s32 0, %v1824_v49  ;;  %v121_v56 = vsub.s32 1, %v1824_v49  ;;  %v149_v57 = vsub.s32 2, %v1824_v49 }
   0x8   :  { %1400 = vmatprep.mubr.msk.f32.mxu0 %vm355_vm0, %v327_v17  ;;  %v558_v25 = vld [vmem:[%s2133_s9] sm:$0xff]  ;;  %v1329_v30 = vld [vmem:[%s2127_s3 + $0x38] sm:$0xff]  ;;  %v1327_v33 = vld [vmem:[%s2127_s3 + $0x28] sm:$0xff]  ;;  %v2139_v60 = vsub.s32 3, %v1824_v49  ;;  %v2137_v17 = vsub.s32 6, %v1824_v49 }
   0x9   :  { %v478_v26 = vld [vmem:[%s2131_s7] sm:$0xff]  ;;  %v1328_v35 = vld [vmem:[%s2127_s3 + $0x30] sm:$0xff]  ;;  %v1809_v38 = vld [vmem:[%s2126_s2 + $0x28] sm:$0xff] }
   0xa   :  { %v1830_v53 = vld [vmem:[%s2124_s0] sm:$0xff] }
   0xb   :  { %68 = vperm.xlu0 %1479, %v50_v4   ;;  %1477 = vset.pattern.permute.xlu1 %v1596_v2  ;;  %v94_v55 = vrot.slane %v1830_v53, %v93_v51  ;;  %v122_v62 = vrot.slane %v1830_v53, %v121_v56  ;;  %v150_v63 = vrot.slane %v1830_v53, %v149_v57  ;;  %v2136_v4 = vsub.s32 4, %v1824_v49 }
   0xc   :  { %78 = vperm.xlu1 %1477, %v1690_v5  }
   0xf   :  { %63 = vperm.xlu0 %1479, %v49_v6  }
  0x10   :  { %1480 = vset.pattern.permute.xlu1 %v1597_v7 }
  0x11   :  { %144 = vperm.xlu1 %1480, %v1678_v3  }
  0x13   :  { %73 = vperm.xlu0 %1479, %v43_v8  }
  0x15   :  { %1481 = vset.pattern.permute.xlu1 %v1596_v2 }
  0x16   :  { %58 = vperm.xlu1 %1481, %v48_v9  }
  0x17   :  { %1484 = vset.pattern.permute.xlu0 %v1598_v10 }
  0x18   :  { %172 = vperm.xlu0 %1484, %v1678_v3  }
  0x1a   :  { %1482 = vset.pattern.permute.xlu1 %v1595_v1 }
  0x1b   :  { %108 = vperm.xlu1 %1482, %v1690_v5  }
  0x1c   :  { %1487 = vset.pattern.permute.xlu0 %v1597_v7 }
  0x1d   :  { %136 = vperm.xlu0 %1487, %v1690_v5  }
  0x1f   :  { %1483 = vset.pattern.permute.xlu1 %v1597_v7 }
  0x20   :  { %140 = vperm.xlu1 %1483, %v1669_v0  }
  0x21   :  { %132 = vperm.xlu0 %1487, %v43_v8  }
  0x24   :  { %1485 = vset.pattern.permute.xlu1 %v1596_v2 }
  0x25   :  { %53 = vperm.xlu1 %1485, %v47_v11   ;;  %1491 = vset.pattern.permute.xlu0 %v1599_v12 }
  0x26   :  { %196 = vperm.xlu0 %1491, %v1669_v0  }
  0x29   :  { %1486 = vset.pattern.permute.xlu1 %v1595_v1 }
  0x2a   :  { %104 = vperm.xlu1 %1486, %v43_v8   ;;  %192 = vperm.xlu0 %1491, %v1690_v5  }
  0x2e   :  { %1488 = vset.pattern.permute.xlu1 %v1598_v10  ;;  %1498 = vset.pattern.permute.xlu0 %v1600_v13 }
  0x2f   :  { %168 = vperm.xlu1 %1488, %v1669_v0   ;;  %216 = vperm.xlu0 %1498, %v43_v8  }
  0x33   :  { %1489 = vset.pattern.permute.xlu1 %v1599_v12  ;;  %1499 = vset.pattern.permute.xlu0 %v1601_v14 }
  0x34   :  { %200 = vperm.xlu1 %1489, %v1678_v3   ;;  %256 = vperm.xlu0 %1499, %v1678_v3  }
  0x38   :  { %1490 = vset.pattern.permute.xlu1 %v1598_v10  ;;  %252 = vperm.xlu0 %1499, %v1669_v0  }
  0x39   :  { %164 = vperm.xlu1 %1490, %v1690_v5  }
  0x3c   :  { %244 = vperm.xlu0 %1499, %v43_v8  }
  0x3d   :  { %1492 = vset.pattern.permute.xlu1 %v1600_v13 }
  0x3e   :  { %228 = vperm.xlu1 %1492, %v1678_v3  }
  0x40   :  { %1502 = vset.pattern.permute.xlu0 %v1596_v2 }
  0x41   :  { %352 = vperm.xlu0 %1502, %v334_v21  }
  0x42   :  { %1493 = vset.pattern.permute.xlu1 %v1598_v10 }
  0x43   :  { %160 = vperm.xlu1 %1493, %v43_v8  }
  0x45   :  { %337 = vperm.xlu0 %1502, %v331_v23  }
  0x47   :  { %1494 = vset.pattern.permute.xlu1 %v1600_v13 }
  0x48   :  { %224 = vperm.xlu1 %1494, %v1669_v0  }
  0x49   :  { %481 = vperm.xlu0 %1502, %v478_v26  }
  0x4c   :  { %1495 = vset.pattern.permute.xlu1 %v1599_v12 }
  0x4d   :  { %188 = vperm.xlu1 %1495, %v43_v8   ;;  %689 = vperm.xlu0 %1502, %v1329_v30  }
  0x51   :  { %1496 = vset.pattern.permute.xlu1 %v1600_v13  ;;  %679 = vperm.xlu0 %1502, %v1327_v33  }
  0x52   :  { %220 = vperm.xlu1 %1496, %v1690_v5  }
  0x55   :  { %1507 = vset.pattern.permute.xlu0 %v1597_v7 }
  0x56   :  { %1497 = vset.pattern.permute.xlu1 %v1602_v15  ;;  %761 = vperm.xlu0 %1507, %v1795_v32  }
  0x57   :  { %284 = vperm.xlu1 %1497, %v1678_v3   ;;  %v178_v3 = vrot.slane %v1830_v53, %v2139_v60 }
  0x5a   :  { %1508 = vset.pattern.permute.xlu0 %v1595_v1 }
  0x5b   :  { %1500 = vset.pattern.permute.xlu1 %v1601_v14  ;;  %737 = vperm.xlu0 %1508, %v1784_v28  }
  0x5c   :  { %248 = vperm.xlu1 %1500, %v1690_v5  }
  0x5f   :  { %733 = vperm.xlu0 %1508, %v1795_v32  }
  0x60   :  { %1501 = vset.pattern.permute.xlu1 %v1602_v15 }
  0x61   :  { %280 = vperm.xlu1 %1501, %v1669_v0  }
  0x65   :  { %276 = vperm.xlu1 %1501, %v1690_v5   ;;  %v2138_v5 = vsub.s32 5, %v1824_v49 }
  0x67   :  { %v234_v23 = vrot.slane %v1830_v53, %v2138_v5 }
  0x69   :  { %272 = vperm.xlu1 %1501, %v43_v8  }
  0x6d   :  { %1503 = vset.pattern.permute.xlu1 %v1596_v2 }
  0x6e   :  { %347 = vperm.xlu1 %1503, %v333_v19  }
  0x72   :  { %342 = vperm.xlu1 %1503, %v332_v22   ;;  %v206_v22 = vrot.slane %v1830_v53, %v2136_v4 }
  0x76   :  { %561 = vperm.xlu1 %1503, %v558_v25  }
  0x7a   :  { %709 = vperm.xlu1 %1503, %v1784_v28  }
  0x7d   :  { %v1749_v16 = vpop.permute.xlu1 %83  ;;  %v1779_v27 = vpop.permute.xlu0 %112 }
  0x7e   :  { %704 = vperm.xlu1 %1503, %v1795_v32   ;;  %v97_v26 = vmul.f32 %v94_v55, %v1749_v16  ;;  %v125_v33 = vmul.f32 %v122_v62, %v1779_v27 }
  0x82   :  { %v1755_v18 = vpop.permute.xlu1 %116  ;;  %v89_v31 = vpop.permute.xlu0 %88  ;;  %684 = vperm.xlu1 %1503, %v1328_v35  }
  0x83   :  { %v98_v59 = vmul.f32 %v94_v55, %v89_v31  ;;  %v126_v8 = vmul.f32 %v122_v62, %v1755_v18  ;;  %v289_v31 = vsub.s32 7, %v1824_v49 }
  0x86   :  { %v69_v36 = vpop.permute.xlu0 %68  ;;  %699 = vperm.xlu1 %1503, %v1809_v38  }
  0x87   :  { %v1760_v20 = vpop.permute.xlu1 %78  ;;  %v102_v0 = vadd.f32 %v98_v59, %v69_v36 }
  0x88   :  { %v96_v4 = vmul.f32 %v94_v55, %v1760_v20 }
  0x89   :  { %v130_v19 = vadd.f32 %v126_v8, %v102_v0 }
  0x8a   :  { %v64_v39 = vpop.permute.xlu0 %63  ;;  %1504 = vset.pattern.permute.xlu1 %v1597_v7 }
  0x8b   :  { %765 = vperm.xlu1 %1504, %v1784_v28   ;;  %v101_v35 = vadd.f32 %v97_v26, %v64_v39 }
  0x8c   :  { %v1771_v24 = vpop.permute.xlu1 %144 }
  0x8d   :  { %v154_v9 = vmul.f32 %v150_v63, %v1771_v24  ;;  %v262_v24 = vrot.slane %v1830_v53, %v2137_v17 }
  0x8e   :  { %v74_v42 = vpop.permute.xlu0 %73 }
  0x8f   :  { %1505 = vset.pattern.permute.xlu1 %v1596_v2  ;;  %v158_v30 = vadd.f32 %v154_v9, %v130_v19  ;;  %v95_v16 = vmul.f32 %v94_v55, %v74_v42  ;;  %v290_v9 = vrot.slane %v1830_v53, %v289_v31  ;;  %v129_v19 = vadd.f32 %v125_v33, %v101_v35 }
  0x91   :  { %v1786_v29 = vpop.permute.xlu1 %58 }
  0x92   :  { %v100_v39 = vadd.f32 %v96_v4, %v1786_v29 }
  0x93   :  { %v173_v44 = vpop.permute.xlu0 %172 }
  0x94   :  { %v182_v21 = vmul.f32 %v178_v3, %v173_v44 }
  0x96   :  { %v1800_v34 = vpop.permute.xlu1 %108  ;;  %v186_v36 = vadd.f32 %v182_v21, %v158_v30 }
  0x98   :  { %v137_v47 = vpop.permute.xlu0 %136 }
  0x99   :  { %v152_v26 = vmul.f32 %v150_v63, %v137_v47 }
  0x9b   :  { %v141_v37 = vpop.permute.xlu1 %140 }
  0x9c   :  { %v133_v50 = vpop.permute.xlu0 %132  ;;  %v153_v59 = vmul.f32 %v150_v63, %v141_v37 }
  0x9d   :  { %v151_v60 = vmul.f32 %v150_v63, %v133_v50 }
  0x9e   :  { %v157_v21 = vadd.f32 %v153_v59, %v129_v19 }
  0xa0   :  { %v1814_v40 = vpop.permute.xlu1 %53 }
  0xa1   :  { %v197_v54 = vpop.permute.xlu0 %196  ;;  %v99_v30 = vadd.f32 %v95_v16, %v1814_v40 }
  0xa2   :  { %v209_v55 = vmul.f32 %v206_v22, %v197_v54 }
  0xa5   :  { %v105_v41 = vpop.permute.xlu1 %104  ;;  %v193_v61 = vpop.permute.xlu0 %192 }
  0xa6   :  { %v208_v59 = vmul.f32 %v206_v22, %v193_v61 }
  0xaa   :  { %v169_v43 = vpop.permute.xlu1 %168  ;;  %v217_v11 = vpop.permute.xlu0 %216 }
  0xab   :  { %v181_v17 = vmul.f32 %v178_v3, %v169_v43  ;;  %v235_v50 = vmul.f32 %v234_v23, %v217_v11 }
  0xad   :  { %v185_v42 = vadd.f32 %v181_v17, %v157_v21 }
  0xaf   :  { %v201_v45 = vpop.permute.xlu1 %200  ;;  %v257_v46 = vpop.permute.xlu0 %256  ;;  %v213_v29 = vadd.f32 %v209_v55, %v185_v42 }
  0xb0   :  { %v210_v18 = vmul.f32 %v206_v22, %v201_v45  ;;  %v124_v45 = vmul.f32 %v122_v62, %v1800_v34  ;;  %v266_v27 = vmul.f32 %v262_v24, %v257_v46 }
  0xb2   :  { %v214_v0 = vadd.f32 %v210_v18, %v186_v36  ;;  %v128_v37 = vadd.f32 %v124_v45, %v100_v39 }
  0xb3   :  { %v253_v46 = vpop.permute.xlu0 %252 }
  0xb4   :  { %v1822_v48 = vpop.permute.xlu1 %164  ;;  %v265_v17 = vmul.f32 %v262_v24, %v253_v46  ;;  %v1881_v46 = vld [vmem:[%s2125_s1 + $0x10] sm:$0xff] }
  0xb5   :  { %v180_v33 = vmul.f32 %v178_v3, %v1822_v48 }
  0xb9   :  { %v229_v52 = vpop.permute.xlu1 %228 }
  0xba   :  { %v238_v44 = vmul.f32 %v234_v23, %v229_v52  ;;  %v123_v52 = vmul.f32 %v122_v62, %v105_v41 }
  0xbc   :  { %v242_v5 = vadd.f32 %v238_v44, %v214_v0  ;;  %v127_v36 = vadd.f32 %v123_v52, %v99_v30  ;;  %v156_v44 = vadd.f32 %v152_v26, %v128_v37 }
  0xbe   :  { %v161_v58 = vpop.permute.xlu1 %160  ;;  %v270_v34 = vadd.f32 %v266_v27, %v242_v5  ;;  %v155_v47 = vadd.f32 %v151_v60, %v127_v36  ;;  %v184_v40 = vadd.f32 %v180_v33, %v156_v44  ;;  %v245_v27 = vpop.permute.xlu0 %244 }
  0xbf   :  { %v179_v41 = vmul.f32 %v178_v3, %v161_v58  ;;  %v263_v60 = vmul.f32 %v262_v24, %v245_v27 }
  0xc0   :  { %v212_v48 = vadd.f32 %v208_v59, %v184_v40 }
  0xc1   :  { %v183_v16 = vadd.f32 %v179_v41, %v155_v47 }
  0xc3   :  { %v225_v6 = vpop.permute.xlu1 %224 }
  0xc4   :  { %v237_v43 = vmul.f32 %v234_v23, %v225_v6 }
  0xc6   :  { %v241_v0 = vadd.f32 %v237_v43, %v213_v29 }
  0xc8   :  { %v189_v25 = vpop.permute.xlu1 %188  ;;  %v269_v6 = vadd.f32 %v265_v17, %v241_v0  ;;  %v1893_v17 = vld [vmem:[%s2125_s1] sm:$0xff] }
  0xc9   :  { %v207_v54 = vmul.f32 %v206_v22, %v189_v25 }
  0xcb   :  { %v211_v19 = vadd.f32 %v207_v54, %v183_v16 }
  0xcd   :  { %v221_v8 = vpop.permute.xlu1 %220  ;;  %v239_v21 = vadd.f32 %v235_v50, %v211_v19  ;;  %v329_v50 = vld [vmem:[%s2128_s4 + $0x10] sm:$0xff]  ;;  %v1326_v19 = vld [vmem:[%s2127_s3 + $0x20] sm:$0xff]  ;;  %s1605_s3 = smov [#allocation2]  }
  0xce   :  { %v236_v45 = vmul.f32 %v234_v23, %v221_v8  ;;  %s1298_s20 = sshll.u32 %s1605_s3, 4  ;;  %s1299_s20 = int_to_ptr.vmem [resolvable:$true] %s1298_s20 }
  0xcf   :  { %s1573_s21 = scalar_lea.vmem %s1299_s20, 16  ;;  %s1577_s22 = scalar_lea.vmem %s1299_s20, 32 }
  0xd0   :  { %v240_v3 = vadd.f32 %v236_v45, %v212_v48  ;;  %v328_v45 = vld [vmem:[%s2128_s4 + $0x8] sm:$0xff]  ;;  %v330_v48 = vld [vmem:[%s2128_s4 + $0x18] sm:$0xff]  ;;  %p1574_p0 = scmp.ne.s32.totalorder %s1299_s20, %s1573_s21  ;;  %p1578_p1 = scmp.lt.s32.totalorder %s1299_s20, %s1299_s20 }
  0xd1   :  { %p1579_p2 = scmp.lt.s32.totalorder %s1577_s22, %s1573_s21 }
  0xd2   :  { %v285_v20 = vpop.permute.xlu1 %284 }
  0xd3   :  { %v294_v18 = vmul.f32 %v290_v9, %v285_v20  ;;  %v267_v20 = vadd.f32 %v263_v60, %v239_v21  ;;  %p1580_p3 = por %p1579_p2, %p1578_p1 }
  0xd5   :  { %v298_v35 = vadd.f32 %v294_v18, %v270_v34  ;;  %p1581_p4 = pnand %p1580_p3, %p1574_p0 }
  0xd7   :  { %v306_v62 = vmin.f32 %v298_v35, 0.0  ;;  %v249_v4 = vpop.permute.xlu1 %248  ;;  %vm302_vm1 = vcmp.gt.f32.partialorder %v298_v35, 0.0 }
  0xd8   :  { %v264_v39 = vmul.f32 %v262_v24, %v249_v4  ;;  %v1875_v24 = vld [vmem:[%s2125_s1 + $0x18] sm:$0xff] }
  0xd9   :  { %v313_v5 = vmul.f32 1.442695, %v306_v62 }
  0xda   :  { %v268_v37 = vadd.f32 %v264_v39, %v240_v3 }
  0xdb   :  { %1529 = vpow2.f32 %v313_v5 }
  0xdc   :  { %v281_v63 = vpop.permute.xlu1 %280 }
  0xdd   :  { %v293_v58 = vmul.f32 %v290_v9, %v281_v63  ;;  %v1603_v63 = vmov 0.0  }
  0xde   :  { %1406 = vmatprep.subr.mxu1 %v1603_v63  ;;  %1414 = vmatprep.mubr.msk.f32.mxu1 %vm1604_vm5, %v1603_v63 }
  0xdf   :  { %v297_v52 = vadd.f32 %v293_v58, %v269_v6  ;;  %v1322_v6 = vld [vmem:[%s2126_s2 + $0x20] sm:$0xff] }
  0xe0   :  { %v277_v61 = vpop.permute.xlu1 %276  ;;  %694 = vperm.xlu1 %1505, %v1322_v6   ;;  %725 = vperm.xlu0 %1508, %v1322_v6  }
  0xe1   :  { %v305_v26 = vmin.f32 %v297_v52, 0.0  ;;  %v292_v22 = vmul.f32 %v290_v9, %v277_v61  ;;  %vm301_vm2 = vcmp.gt.f32.partialorder %v297_v52, 0.0 }
  0xe3   :  { %v311_v25 = vmul.f32 1.442695, %v305_v26  ;;  %v296_v30 = vadd.f32 %v292_v22, %v268_v37 }
  0xe4   :  { %v273_v8 = vpop.permute.xlu1 %272  ;;  %1506 = vset.pattern.permute.xlu1 %v1595_v1  ;;  %1513 = vset.pattern.permute.xlu0 %v1599_v12 }
  0xe5   :  { %1531 = vpow2.f32 %v311_v25  ;;  %v304_v11 = vmin.f32 %v296_v30, 0.0  ;;  %v291_v23 = vmul.f32 %v290_v9, %v273_v8  ;;  %vm300_vm3 = vcmp.gt.f32.partialorder %v296_v30, 0.0  ;;  %729 = vperm.xlu1 %1506, %v1809_v38   ;;  %821 = vperm.xlu0 %1513, %v1784_v28  }
  0xe7   :  { %v309_v42 = vmul.f32 1.442695, %v304_v11  ;;  %v295_v55 = vadd.f32 %v291_v23, %v267_v20 }
  0xe8   :  { %v1530_v34 = vpop.eup %1529 }
  0xe9   :  { %1533 = vpow2.f32 %v309_v42  ;;  %v303_v18 = vmin.f32 %v295_v55, 0.0  ;;  %v1311_v36 = vadd.f32 -1.0, %v1530_v34  ;;  %vm299_vm4 = vcmp.gt.f32.partialorder %v295_v55, 0.0  ;;  %1509 = vset.pattern.permute.xlu1 %v1598_v10  ;;  %817 = vperm.xlu0 %1513, %v1795_v32   ;;  %v348_v1 = vpop.permute.xlu1 %347 }
  0xea   :  { %793 = vperm.xlu1 %1509, %v1784_v28  }
  0xeb   :  { %v307_v33 = vmul.f32 1.442695, %v303_v18  ;;  %v322_v43 = vsel %vm302_vm1, %v298_v35, %v1311_v36  ;;  %v1887_v35 = vld [vmem:[%s2125_s1 + $0x8] sm:$0xff]  ;;  %v477_v18 = vld [vmem:[%s2130_s6] sm:$0xff] }
  0xec   :  { %v326_v44 = vadd.f32 %v322_v43, %v1875_v24  ;;  %v557_v36 = vld [vmem:[%s2132_s8] sm:$0xff] }
  0xed   :  { %1535 = vpow2.f32 %v307_v33  ;;  %1517 = vset.pattern.permute.xlu0 %v1598_v10 }
  0xee   :  { %1392 = vmatprep.subr.mxu0 %v326_v44  ;;  %1510 = vset.pattern.permute.xlu1 %v1596_v2 }
  0xef   :  { %1393 = vmatpush3.msra.mxu0 %v326_v44  ;;  %781 = vperm.xlu0 %1517, %v1322_v6  }
  0xf0   :  { %674 = vperm.xlu1 %1510, %v1326_v19  }
  0xf2   :  { %v1532_v9 = vpop.eup %1531 }
  0xf3   :  { %v1310_v29 = vadd.f32 -1.0, %v1532_v9  ;;  %1523 = vset.pattern.permute.xlu0 %v1600_v13 }
  0xf4   :  { %1511 = vset.pattern.permute.xlu1 %v1597_v7  ;;  %837 = vperm.xlu0 %1523, %v1322_v6  }
  0xf5   :  { %v321_v41 = vsel %vm301_vm2, %v297_v52, %v1310_v29  ;;  %757 = vperm.xlu1 %1511, %v1809_v38  }
  0xf6   :  { %v1534_v62 = vpop.eup %1533  ;;  %v325_v4 = vadd.f32 %v321_v41, %v1881_v46 }
  0xf7   :  { %v1309_v47 = vadd.f32 -1.0, %v1534_v62 }
  0xf8   :  { %1394 = vmatprep.subr.mxu0 %v325_v4  ;;  %1524 = vset.pattern.permute.xlu0 %v1601_v14 }
  0xf9   :  { %1395 = vmatpush3.msra.mxu0 %v325_v4  ;;  %v320_v59 = vsel %vm300_vm3, %v296_v30, %v1309_v47  ;;  %1512 = vset.pattern.permute.xlu1 %v1598_v10 }
  0xfa   :  { %v1536_v40 = vpop.eup %1535  ;;  %v324_v0 = vadd.f32 %v320_v59, %v1887_v35  ;;  %877 = vperm.xlu0 %1524, %v1784_v28   ;;  %789 = vperm.xlu1 %1512, %v1795_v32   ;;  %v1334_v59 = vld [vmem:[%s2128_s4 + $0x20] sm:$0xff] }
  0xfb   :  { %v1308_v54 = vadd.f32 -1.0, %v1536_v40 }
  0xfc   :  { %1396 = vmatprep.subr.mxu0 %v324_v0 }
  0xfd   :  { %1397 = vmatpush3.msra.mxu0 %v324_v0  ;;  %v319_v5 = vsel %vm299_vm4, %v295_v55, %v1308_v54  ;;  %v1340_v0 = vld [vmem:[%s2129_s5 + $0x30] sm:$0xff]  ;;  %v1341_v54 = vld [vmem:[%s2129_s5 + $0x38] sm:$0xff]  ;;  %vm653_vm4 = vcmask 15360  }
  0xfe   :  { %v323_v16 = vadd.f32 %v319_v5, %v1893_v17  ;;  %873 = vperm.xlu0 %1524, %v1795_v32   ;;  %1514 = vset.pattern.permute.xlu1 %v1597_v7  ;;  %v353_v7 = vpop.permute.xlu0 %352  ;;  %v1339_v5 = vld [vmem:[%s2129_s5 + $0x28] sm:$0xff] }
  0xff   :  { %753 = vperm.xlu1 %1514, %v1322_v6  }
 0x100   :  { %1398 = vmatprep.subr.mxu0 %v323_v16 }
 0x101   :  { %1399 = vmatpush3.msra.mxu0 %v323_v16  ;;  %v1338_v16 = vld [vmem:[%s2129_s5 + $0x20] sm:$0xff] }
 0x102   :  { %1401 = vmatmul.mubr.msk.f32.vlgmr.msra.gmra.mxu0 %vm355_vm0, %v328_v45  ;;  %1417 = vmatprep.subr.mxu0 %v1603_v63  ;;  %v338_v27 = vpop.permute.xlu0 %337 }
 0x103   :  { %1403 = vmatprep.mubr.msk.f32.mxu0 %vm355_vm0, %v329_v50  ;;  %865 = vperm.xlu0 %1524, %v1322_v6   ;;  %v1354_v50 = vld [vmem:[%s2133_s9 + $0x8] sm:$0xff] }
 0x104   :  { %1515 = vset.pattern.permute.xlu1 %v1598_v10  ;;  %v343_v10 = vpop.permute.xlu1 %342 }
 0x105   :  { %785 = vperm.xlu1 %1515, %v1809_v38  }
 0x106   :  { %1404 = vmatmul.mubr.msk.f32.gmra.mxu0 %vm355_vm0, %v330_v48  ;;  %v1351_v48 = vld [vmem:[%s2131_s7 + $0x8] sm:$0xff] }
 0x107   :  { %1425 = vmatprep.mubr.msk.f32.mxu0 %vm1604_vm5, %v1603_v63  ;;  %1527 = vset.pattern.permute.xlu0 %v1596_v2 }
 0x108   :  { %v562_v43 = vpop.permute.xlu1 %561  ;;  %975 = vperm.xlu0 %1527, %v1341_v54  }
 0x109   :  { %1516 = vset.pattern.permute.xlu1 %v1600_v13 }
 0x10a   :  { %849 = vperm.xlu1 %1516, %v1784_v28  }
 0x10c   :  { %v1975_v44 = vpop.permute.xlu1 %709  ;;  %960 = vperm.xlu0 %1527, %v1338_v16  }
 0x10e   :  { %1518 = vset.pattern.permute.xlu1 %v1599_v12 }
 0x10f   :  { %813 = vperm.xlu1 %1518, %v1809_v38  }
 0x110   :  { %v1977_v9 = vpop.permute.xlu1 %704  ;;  %1105 = vperm.xlu0 %1527, %v1351_v48  }
 0x113   :  { %1519 = vset.pattern.permute.xlu1 %v1600_v13 }
 0x114   :  { %845 = vperm.xlu1 %1519, %v1795_v32   ;;  %v1979_v29 = vpop.permute.xlu1 %684 }
 0x118   :  { %1520 = vset.pattern.permute.xlu1 %v1599_v12  ;;  %v1981_v41 = vpop.permute.xlu1 %699 }
 0x119   :  { %809 = vperm.xlu1 %1520, %v1322_v6  }
 0x11c   :  { %v1983_v62 = vpop.permute.xlu1 %765 }
 0x11d   :  { %1521 = vset.pattern.permute.xlu1 %v1600_v13 }
 0x11e   :  { %841 = vperm.xlu1 %1521, %v1809_v38  }
 0x122   :  { %1522 = vset.pattern.permute.xlu1 %v1602_v15 }
 0x123   :  { %905 = vperm.xlu1 %1522, %v1784_v28  }
 0x127   :  { %1525 = vset.pattern.permute.xlu1 %v1601_v14 }
 0x128   :  { %869 = vperm.xlu1 %1525, %v1809_v38  }
 0x12c   :  { %1526 = vset.pattern.permute.xlu1 %v1602_v15 }
 0x12d   :  { %901 = vperm.xlu1 %1526, %v1795_v32  }
 0x131   :  { %897 = vperm.xlu1 %1526, %v1809_v38  }
 0x135   :  { %893 = vperm.xlu1 %1526, %v1322_v6   ;;  %v482_v6 = vpop.permute.xlu0 %481 }
 0x139   :  { %1528 = vset.pattern.permute.xlu1 %v1596_v2 }
 0x13a   :  { %970 = vperm.xlu1 %1528, %v1340_v0  }
 0x13e   :  { %965 = vperm.xlu1 %1528, %v1339_v5  }
 0x142   :  { %1187 = vperm.xlu1 %1528, %v1354_v50  }
 0x15b   :  { %v1985_v4 = vpop.permute.xlu1 %694 }
 0x160   :  { %v1987_v47 = vpop.permute.xlu1 %729 }
 0x165   :  { %v1993_v40 = vpop.permute.xlu1 %793 }
 0x16b   :  { %v2007_v45 = vpop.permute.xlu1 %674 }
 0x170   :  { %v2015_v19 = vpop.permute.xlu1 %757 }
 0x1c2   :  { %v1402_v12 = vpop.f32.mrf.mxu0 }
 0x1c3   :  { %v440_v13 = vadd.f32 %v1402_v12, %v343_v10 }
 0x1c4   :  { %v434_v28 = vpop.f32.mrf.mxu0 }
 0x1c5   :  { %v458_v39 = vmin.f32 %v440_v13, 0.0  ;;  %v435_v14 = vadd.f32 %v434_v28, %v338_v27  ;;  %vm454_vm8 = vcmp.gt.f32.partialorder %v440_v13, 0.0 }
 0x1c6   :  { %v1405_v58 = vpop.f32.mrf.mxu0 }
 0x1c7   :  { %v457_v3 = vmin.f32 %v435_v14, 0.0  ;;  %v450_v52 = vadd.f32 %v1405_v58, %v353_v7  ;;  %v463_v15 = vmul.f32 1.442695, %v458_v39  ;;  %vm453_vm9 = vcmp.gt.f32.partialorder %v435_v14, 0.0  ;;  %v2017_v7 = vpop.permute.xlu1 %789 }
 0x1c8   :  { %v444_v60 = vpop.f32.mrf.mxu0 }
 0x1c9   :  { %v460_v32 = vmin.f32 %v450_v52, 0.0  ;;  %v445_v61 = vadd.f32 %v444_v60, %v348_v1  ;;  %v461_v38 = vmul.f32 1.442695, %v457_v3  ;;  %1537 = vpow2.f32 %v463_v15  ;;  %v690_v1 = vpop.permute.xlu0 %689 }
 0x1ca   :  { %vm456_vm6 = vcmp.gt.f32.partialorder %v450_v52, 0.0 }
 0x1cb   :  { %v467_v21 = vmul.f32 1.442695, %v460_v32  ;;  %v459_v37 = vmin.f32 %v445_v61, 0.0  ;;  %vm455_vm7 = vcmp.gt.f32.partialorder %v445_v61, 0.0  ;;  %v754_v12 = vpop.permute.xlu1 %753 }
 0x1cd   :  { %1539 = vpow2.f32 %v467_v21  ;;  %v465_v2 = vmul.f32 1.442695, %v459_v37  ;;  %v680_v10 = vpop.permute.xlu0 %679 }
 0x1ce   :  { %1541 = vpow2.f32 %v461_v38 }
 0x1cf   :  { %1543 = vpow2.f32 %v465_v2 }
 0x1d6   :  { %v1538_v26 = vpop.eup %1537 }
 0x1d7   :  { %v1317_v23 = vadd.f32 -1.0, %v1538_v26 }
 0x1d9   :  { %v474_v34 = vsel %vm454_vm8, %v440_v13, %v1317_v23  ;;  %v2019_v13 = vpop.permute.xlu0 %761 }
 0x1da   :  { %v1540_v22 = vpop.eup %1539 }
 0x1db   :  { %v1542_v25 = vpop.eup %1541  ;;  %v1319_v30 = vadd.f32 -1.0, %v1540_v22 }
 0x1dc   :  { %v1544_v8 = vpop.eup %1543  ;;  %v1316_v55 = vadd.f32 -1.0, %v1542_v25 }
 0x1dd   :  { %v476_v20 = vsel %vm456_vm6, %v450_v52, %v1319_v30  ;;  %v1318_v11 = vadd.f32 -1.0, %v1544_v8  ;;  %v738_v60 = vpop.permute.xlu0 %737 }
 0x1de   :  { %1407 = vmatpush3.msra.mxu1 %v476_v20  ;;  %1418 = vmatpush3.msra.mxu0 %v476_v20  ;;  %v473_v33 = vsel %vm453_vm9, %v435_v14, %v1316_v55  ;;  %v786_v14 = vpop.permute.xlu1 %785 }
 0x1df   :  { %1408 = vmatprep.subr.mxu1 %v1603_v63  ;;  %1419 = vmatprep.subr.mxu0 %v1603_v63  ;;  %v475_v42 = vsel %vm455_vm7, %v445_v61, %v1318_v11 }
 0x1e0   :  { %1409 = vmatpush3.msra.mxu1 %v475_v42  ;;  %1420 = vmatpush3.msra.mxu0 %v475_v42 }
 0x1e1   :  { %1410 = vmatprep.subr.mxu1 %v1603_v63  ;;  %1421 = vmatprep.subr.mxu0 %v1603_v63  ;;  %v734_v38 = vpop.permute.xlu0 %733 }
 0x1e2   :  { %1411 = vmatpush3.msra.mxu1 %v474_v34  ;;  %1422 = vmatpush3.msra.mxu0 %v474_v34  ;;  %v2021_v61 = vpop.permute.xlu1 %849 }
 0x1e3   :  { %1412 = vmatprep.subr.mxu1 %v1603_v63  ;;  %1423 = vmatprep.subr.mxu0 %v1603_v63 }
 0x1e4   :  { %1413 = vmatpush3.msra.mxu1 %v473_v33  ;;  %1424 = vmatpush3.msra.mxu0 %v473_v33 }
 0x1e5   :  { %1415 = vmatmul.mubr.msk.f32.vlgmr.msra.gmra.mxu1 %vm355_vm0, %v477_v18  ;;  %1426 = vmatmul.mubr.msk.f32.vlgmr.msra.gmra.mxu0 %vm355_vm0, %v557_v36  ;;  %v726_v37 = vpop.permute.xlu0 %725 }
 0x1e6   :  { %1442 = vmatprep.subr.mxu0 %v1603_v63  ;;  %1450 = vmatprep.mubr.msk.f32.mxu0 %vm1604_vm5, %v1603_v63  ;;  %v814_v21 = vpop.permute.xlu1 %813 }
 0x1e7   :  { %1436 = vmatprep.mubr.msk.f32.mxu1 %vm355_vm0, %v1334_v59 }
 0x1e9   :  { %v822_v25 = vpop.permute.xlu0 %821 }
 0x1ea   :  { %v2023_v2 = vpop.permute.xlu1 %845 }
 0x1ed   :  { %v2027_v8 = vpop.permute.xlu0 %817 }
 0x1ee   :  { %v2025_v30 = vpop.permute.xlu1 %809 }
 0x1f1   :  { %v782_v23 = vpop.permute.xlu0 %781 }
 0x1f2   :  { %v842_v20 = vpop.permute.xlu1 %841 }
 0x1f5   :  { %v2034_v5 = vpop.permute.xlu0 %837 }
 0x1f6   :  { %v2029_v34 = vpop.permute.xlu1 %905 }
 0x1fa   :  { %v870_v50 = vpop.permute.xlu1 %869 }
 0x2a5   :  { %v553_v27 = vpop.f32.mrf.mxu1  ;;  %v633_v28 = vpop.f32.mrf.mxu0 }
 0x2a6   :  { %v634_v39 = vadd.f32 %v633_v28, %v562_v43  ;;  %v554_v11 = vadd.f32 %v553_v27, %v482_v6  ;;  %v2140_v28 = vsub.s32 3, %v1824_v49 }
 0x2a7   :  { %v1427_v58 = vpop.f32.mrf.mxu0  ;;  %v1416_v3 = vpop.f32.mrf.mxu1 }
 0x2a8   :  { %v637_v52 = vand.u32 2147483647, %v634_v39  ;;  %vm642_vm10 = vcmp.ge.f32.partialorder %v634_v39, 0.0  ;;  %v650_v36 = vsub.f32 %v1830_v53, %v554_v11  ;;  %v646_v43 = vmin.f32 %v634_v39, 0.0  ;;  %v878_v3 = vpop.permute.xlu0 %877 }
 0x2aa   :  { %v638_v15 = vsub.f32 0.0, %v637_v52 }
 0x2ac   :  { %v639_v32 = vmul.f32 1.442695, %v638_v15  ;;  %v2141_v15 = vsub.s32 5, %v1824_v49 }
 0x2ae   :  { %1545 = vpow2.f32 %v639_v32  ;;  %v2142_v32 = vsub.s32 4, %v1824_v49 }
 0x2bb   :  { %v1546_v26 = vpop.eup %1545 }
 0x2bc   :  { %v641_v22 = vadd.f32 1.0, %v1546_v26  ;;  %v643_v55 = vsel %vm642_vm10, 1.0, %v1546_v26 }
 0x2be   :  { %1547 = vrcp.f32 %v641_v22 }
 0x2bf   :  { %1549 = vlog2.f32 %v641_v22 }
 0x2cb   :  { %v1548_v42 = vpop.eup %1547 }
 0x2cc   :  { %v1550_v18 = vpop.eup %1549  ;;  %v645_v33 = vmul.f32 %v1548_v42, %v643_v55 }
 0x2cd   :  { %v648_v59 = vmul.f32 0.6931472, %v1550_v18 }
 0x2ce   :  { %v651_v0 = vmul.f32 %v650_v36, %v645_v33 }
 0x2cf   :  { %v2032_v54 = vsub.f32 %v646_v43, %v648_v59 }
 0x2d0   :  { %v2036_v16 = vadd.f32 %v651_v0, %v554_v11  ;;  %v902_v11 = vpop.permute.xlu1 %901 }
 0x2d2   :  { %v715_v48 = vrot.slane %v2036_v16, %v93_v51  ;;  %v743_v6 = vrot.slane %v2036_v16, %v121_v56  ;;  %v771_v53 = vrot.slane %v2036_v16, %v149_v57  ;;  %v799_v39 = vrot.slane %v2036_v16, %v2140_v28 }
 0x2d3   :  { %v855_v56 = vrot.slane %v2036_v16, %v2141_v15  ;;  %v827_v57 = vrot.slane %v2036_v16, %v2142_v32 }
 0x2d4   :  { %v717_v27 = vmul.f32 %v715_v48, %v1981_v41  ;;  %v719_v58 = vmul.f32 %v715_v48, %v1975_v44  ;;  %v745_v51 = vmul.f32 %v743_v6, %v1987_v47  ;;  %v747_v41 = vmul.f32 %v743_v6, %v738_v60 }
 0x2d5   :  { %v718_v22 = vmul.f32 %v715_v48, %v1977_v9  ;;  %v911_v44 = vrot.slane %v2036_v16, %v289_v31  ;;  %v773_v47 = vmul.f32 %v771_v53, %v2015_v19  ;;  %v716_v55 = vmul.f32 %v715_v48, %v1985_v4  ;;  %v874_v19 = vpop.permute.xlu0 %873 }
 0x2d6   :  { %v721_v52 = vadd.f32 %v717_v27, %v680_v10  ;;  %v723_v26 = vadd.f32 %v719_v58, %v690_v1  ;;  %v772_v10 = vmul.f32 %v771_v53, %v754_v12  ;;  %v775_v36 = vmul.f32 %v771_v53, %v1983_v62 }
 0x2d7   :  { %v722_v33 = vadd.f32 %v718_v22, %v1979_v29  ;;  %v746_v1 = vmul.f32 %v743_v6, %v734_v38  ;;  %v801_v43 = vmul.f32 %v799_v39, %v786_v14  ;;  %v720_v9 = vadd.f32 %v716_v55, %v2007_v45 }
 0x2d8   :  { %v749_v42 = vadd.f32 %v745_v51, %v721_v52  ;;  %v751_v18 = vadd.f32 %v747_v41, %v723_v26  ;;  %v744_v59 = vmul.f32 %v743_v6, %v726_v37  ;;  %v774_v31 = vmul.f32 %v771_v53, %v2019_v13  ;;  %v898_v37 = vpop.permute.xlu1 %897 }
 0x2d9   :  { %v750_v12 = vadd.f32 %v746_v1, %v722_v33  ;;  %v803_v27 = vmul.f32 %v799_v39, %v1993_v40  ;;  %v829_v4 = vmul.f32 %v827_v57, %v814_v21  ;;  %v2143_v62 = vsub.s32 6, %v1824_v49 }
 0x2da   :  { %v777_v60 = vadd.f32 %v773_v47, %v749_v42  ;;  %v779_v0 = vadd.f32 %v775_v36, %v751_v18  ;;  %v748_v48 = vadd.f32 %v744_v59, %v720_v9  ;;  %v831_v14 = vmul.f32 %v827_v57, %v822_v25  ;;  %v866_v47 = vpop.permute.xlu0 %865 }
 0x2db   :  { %v883_v29 = vrot.slane %v2036_v16, %v2143_v62  ;;  %v778_v38 = vadd.f32 %v774_v31, %v750_v12  ;;  %v802_v45 = vmul.f32 %v799_v39, %v2017_v7  ;;  %v857_v13 = vmul.f32 %v855_v56, %v842_v20 }
 0x2dc   :  { %v805_v28 = vadd.f32 %v801_v43, %v777_v60  ;;  %v807_v58 = vadd.f32 %v803_v27, %v779_v0  ;;  %v776_v53 = vadd.f32 %v772_v10, %v748_v48  ;;  %v800_v52 = vmul.f32 %v799_v39, %v782_v23 }
 0x2dd   :  { %v859_v40 = vmul.f32 %v855_v56, %v2021_v61  ;;  %v806_v15 = vadd.f32 %v802_v45, %v778_v38  ;;  %v830_v21 = vmul.f32 %v827_v57, %v2027_v8  ;;  %v828_v49 = vmul.f32 %v827_v57, %v2025_v30  ;;  %v894_v30 = vpop.permute.xlu1 %893 }
 0x2de   :  { %v833_v6 = vadd.f32 %v829_v4, %v805_v28  ;;  %v835_v51 = vadd.f32 %v831_v14, %v807_v58  ;;  %v804_v26 = vadd.f32 %v800_v52, %v776_v53  ;;  %v885_v41 = vmul.f32 %v883_v29, %v870_v50  ;;  %v976_v52 = vpop.permute.xlu0 %975 }
 0x2df   :  { %v858_v25 = vmul.f32 %v855_v56, %v2023_v2  ;;  %v834_v22 = vadd.f32 %v830_v21, %v806_v15  ;;  %v887_v42 = vmul.f32 %v883_v29, %v878_v3  ;;  %v856_v23 = vmul.f32 %v855_v56, %v2034_v5 }
 0x2e0   :  { %v861_v32 = vadd.f32 %v857_v13, %v833_v6  ;;  %v863_v7 = vadd.f32 %v859_v40, %v835_v51  ;;  %v832_v10 = vadd.f32 %v828_v49, %v804_v26  ;;  %v913_v61 = vmul.f32 %v911_v44, %v898_v37 }
 0x2e1   :  { %v915_v39 = vmul.f32 %v911_v44, %v2029_v34  ;;  %v862_v8 = vadd.f32 %v858_v25, %v834_v22  ;;  %v886_v18 = vmul.f32 %v883_v29, %v874_v19  ;;  %v884_v50 = vmul.f32 %v883_v29, %v866_v47 }
 0x2e2   :  { %v889_v20 = vadd.f32 %v885_v41, %v861_v32  ;;  %v891_v55 = vadd.f32 %v887_v42, %v863_v7  ;;  %v860_v57 = vadd.f32 %v856_v23, %v832_v10  ;;  %v914_v33 = vmul.f32 %v911_v44, %v902_v11  ;;  %v961_v21 = vpop.permute.xlu0 %960 }
 0x2e3   :  { %v890_v1 = vadd.f32 %v886_v18, %v862_v8  ;;  %v912_v3 = vmul.f32 %v911_v44, %v894_v30 }
 0x2e4   :  { %v917_v36 = vadd.f32 %v913_v61, %v889_v20  ;;  %v919_v2 = vadd.f32 %v915_v39, %v891_v55  ;;  %v888_v43 = vadd.f32 %v884_v50, %v860_v57 }
 0x2e5   :  { %v918_v59 = vadd.f32 %v914_v33, %v890_v1 }
 0x2e6   :  { %v925_v60 = vmin.f32 %v917_v36, 0.0  ;;  %v927_v9 = vmin.f32 %v919_v2, 0.0  ;;  %v916_v5 = vadd.f32 %v912_v3, %v888_v43  ;;  %vm923_vm11 = vcmp.gt.f32.partialorder %v919_v2, 0.0  ;;  %v1350_v3 = vld [vmem:[%s2130_s6 + $0x8] sm:$0xff] }
 0x2e7   :  { %v926_v0 = vmin.f32 %v918_v59, 0.0  ;;  %vm921_vm12 = vcmp.gt.f32.partialorder %v917_v36, 0.0  ;;  %vm922_vm13 = vcmp.gt.f32.partialorder %v918_v59, 0.0  ;;  %v1353_v43 = vld [vmem:[%s2132_s8 + $0x8] sm:$0xff] }
 0x2e8   :  { %v930_v31 = vmul.f32 1.442695, %v925_v60  ;;  %v934_v56 = vmul.f32 1.442695, %v927_v9  ;;  %v924_v34 = vmin.f32 %v916_v5, 0.0  ;;  %vm920_vm14 = vcmp.gt.f32.partialorder %v916_v5, 0.0 }
 0x2e9   :  { %v932_v12 = vmul.f32 1.442695, %v926_v0 }
 0x2ea   :  { %1551 = vpow2.f32 %v930_v31  ;;  %v928_v27 = vmul.f32 1.442695, %v924_v34 }
 0x2eb   :  { %1553 = vpow2.f32 %v934_v56 }
 0x2ec   :  { %1555 = vpow2.f32 %v932_v12 }
 0x2ed   :  { %1557 = vpow2.f32 %v928_v27 }
 0x2f7   :  { %v1552_v19 = vpop.eup %1551 }
 0x2f8   :  { %v1554_v11 = vpop.eup %1553  ;;  %v1331_v4 = vadd.f32 -1.0, %v1552_v19 }
 0x2f9   :  { %v1333_v28 = vadd.f32 -1.0, %v1554_v11  ;;  %v1556_v48 = vpop.eup %1555 }
 0x2fa   :  { %v1558_v44 = vpop.eup %1557  ;;  %v1332_v29 = vadd.f32 -1.0, %v1556_v48  ;;  %v941_v45 = vsel %vm921_vm12, %v917_v36, %v1331_v4  ;;  %v1106_v4 = vpop.permute.xlu0 %1105 }
 0x2fb   :  { %v943_v62 = vsel %vm923_vm11, %v919_v2, %v1333_v28  ;;  %v1330_v58 = vadd.f32 -1.0, %v1558_v44  ;;  %v945_v13 = vadd.f32 %v941_v45, %v1887_v35  ;;  %v1337_v35 = vld [vmem:[%s2128_s4 + $0x38] sm:$0xff] }
 0x2fc   :  { %v947_v38 = vadd.f32 %v943_v62, %v1875_v24  ;;  %v942_v14 = vsel %vm922_vm13, %v918_v59, %v1332_v29  ;;  %v1335_v24 = vld [vmem:[%s2128_s4 + $0x28] sm:$0xff] }
 0x2fd   :  { %v946_v37 = vadd.f32 %v942_v14, %v1881_v46  ;;  %v940_v6 = vsel %vm920_vm14, %v916_v5, %v1330_v58  ;;  %v1336_v46 = vld [vmem:[%s2128_s4 + $0x30] sm:$0xff] }
 0x2fe   :  { %1428 = vmatprep.subr.mxu1 %v947_v38  ;;  %v944_v53 = vadd.f32 %v940_v6, %v1893_v17  ;;  %v971_v17 = vpop.permute.xlu1 %970 }
 0x2ff   :  { %1429 = vmatpush3.msra.mxu1 %v947_v38 }
 0x300   :  { %1430 = vmatprep.subr.mxu1 %v946_v37 }
 0x301   :  { %1431 = vmatpush3.msra.mxu1 %v946_v37 }
 0x302   :  { %1432 = vmatprep.subr.mxu1 %v945_v13  ;;  %v966_v40 = vpop.permute.xlu1 %965 }
 0x303   :  { %1433 = vmatpush3.msra.mxu1 %v945_v13 }
 0x304   :  { %1434 = vmatprep.subr.mxu1 %v944_v53 }
 0x305   :  { %1435 = vmatpush3.msra.mxu1 %v944_v53 }
 0x306   :  { %1437 = vmatmul.mubr.msk.f32.vlgmr.msra.gmra.mxu1 %vm355_vm0, %v1335_v24  ;;  %1453 = vmatprep.subr.mxu1 %v1603_v63  ;;  %v1188_v59 = vpop.permute.xlu1 %1187 }
 0x307   :  { %1439 = vmatprep.mubr.msk.f32.mxu1 %vm355_vm0, %v1336_v46 }
 0x30a   :  { %1440 = vmatmul.mubr.msk.f32.gmra.mxu1 %vm355_vm0, %v1337_v35 }
 0x30b   :  { %1461 = vmatprep.mubr.msk.f32.mxu1 %vm1604_vm5, %v1603_v63  ;;  %vm1288_vm5 = vcmask 8192  }
 0x3c6   :  { %v1438_v51 = vpop.f32.mrf.mxu1 }
 0x3c7   :  { %v1062_v15 = vadd.f32 %v1438_v51, %v966_v40 }
 0x3c8   :  { %v1056_v49 = vpop.f32.mrf.mxu1 }
 0x3c9   :  { %v1057_v32 = vadd.f32 %v1056_v49, %v961_v21  ;;  %v1080_v26 = vmin.f32 %v1062_v15, 0.0  ;;  %vm1076_vm2 = vcmp.gt.f32.partialorder %v1062_v15, 0.0 }
 0x3ca   :  { %v1441_v41 = vpop.f32.mrf.mxu1 }
 0x3cb   :  { %v1079_v25 = vmin.f32 %v1057_v32, 0.0  ;;  %v1072_v22 = vadd.f32 %v1441_v41, %v976_v52  ;;  %v1085_v47 = vmul.f32 1.442695, %v1080_v26  ;;  %vm1075_vm3 = vcmp.gt.f32.partialorder %v1057_v32, 0.0 }
 0x3cc   :  { %v1066_v7 = vpop.f32.mrf.mxu1 }
 0x3cd   :  { %v1082_v42 = vmin.f32 %v1072_v22, 0.0  ;;  %v1067_v20 = vadd.f32 %v1066_v7, %v971_v17  ;;  %v1083_v10 = vmul.f32 1.442695, %v1079_v25  ;;  %vm1078_vm15 = vcmp.gt.f32.partialorder %v1072_v22, 0.0 }
 0x3cf   :  { %v1089_v23 = vmul.f32 1.442695, %v1082_v42  ;;  %v1081_v61 = vmin.f32 %v1067_v20, 0.0  ;;  %vm1077_vm1 = vcmp.gt.f32.partialorder %v1067_v20, 0.0 }
 0x3d1   :  { %1559 = vpow2.f32 %v1089_v23  ;;  %v1087_v39 = vmul.f32 1.442695, %v1081_v61 }
 0x3d2   :  { %1561 = vpow2.f32 %v1085_v47 }
 0x3d3   :  { %1563 = vpow2.f32 %v1083_v10 }
 0x3d4   :  { %1565 = vpow2.f32 %v1087_v39 }
 0x3de   :  { %v1560_v55 = vpop.eup %1559 }
 0x3df   :  { %v1562_v8 = vpop.eup %1561  ;;  %v1349_v18 = vadd.f32 -1.0, %v1560_v55 }
 0x3e0   :  { %v1564_v30 = vpop.eup %1563  ;;  %v1347_v33 = vadd.f32 -1.0, %v1562_v8 }
 0x3e1   :  { %v1566_v57 = vpop.eup %1565  ;;  %v1098_v36 = vsel %vm1078_vm15, %v1072_v22, %v1349_v18  ;;  %v1346_v1 = vadd.f32 -1.0, %v1564_v30 }
 0x3e2   :  { %1443 = vmatpush3.msra.mxu0 %v1098_v36  ;;  %1454 = vmatpush3.msra.mxu1 %v1098_v36  ;;  %v1348_v50 = vadd.f32 -1.0, %v1566_v57  ;;  %v1096_v60 = vsel %vm1076_vm2, %v1062_v15, %v1347_v33 }
 0x3e3   :  { %1444 = vmatprep.subr.mxu0 %v1603_v63  ;;  %1455 = vmatprep.subr.mxu1 %v1603_v63  ;;  %v1095_v9 = vsel %vm1075_vm3, %v1057_v32, %v1346_v1 }
 0x3e4   :  { %v1097_v2 = vsel %vm1077_vm1, %v1067_v20, %v1348_v50 }
 0x3e5   :  { %1445 = vmatpush3.msra.mxu0 %v1097_v2  ;;  %1456 = vmatpush3.msra.mxu1 %v1097_v2 }
 0x3e6   :  { %1446 = vmatprep.subr.mxu0 %v1603_v63  ;;  %1457 = vmatprep.subr.mxu1 %v1603_v63 }
 0x3e7   :  { %1447 = vmatpush3.msra.mxu0 %v1096_v60  ;;  %1458 = vmatpush3.msra.mxu1 %v1096_v60 }
 0x3e8   :  { %1448 = vmatprep.subr.mxu0 %v1603_v63  ;;  %1459 = vmatprep.subr.mxu1 %v1603_v63  ;;  %v654_v63 = vsel %vm653_vm4, %v2032_v54, 0.0 }
 0x3e9   :  { %1449 = vmatpush3.msra.mxu0 %v1095_v9  ;;  %1460 = vmatpush3.msra.mxu1 %v1095_v9  ;;  %v655_v48 = vrot.slane %v654_v63, 4 }
 0x3ea   :  { %1451 = vmatmul.mubr.msk.f32.vlgmr.msra.gmra.mxu0 %vm355_vm0, %v1350_v3  ;;  %1462 = vmatmul.mubr.msk.f32.vlgmr.msra.gmra.mxu1 %vm355_vm0, %v1353_v43 }
 0x3eb   :  { %v656_v45 = vadd.f32 %v655_v48, %v654_v63 }
 0x3ed   :  { %v657_v46 = vrot.slane %v656_v45, 2 }
 0x3ef   :  { %v658_v17 = vadd.f32 %v657_v46, %v656_v45 }
 0x4aa   :  { %v1177_v31 = vpop.f32.mrf.mxu0  ;;  %v1259_v5 = vpop.f32.mrf.mxu1 }
 0x4ab   :  { %v1260_v56 = vadd.f32 %v1259_v5, %v1188_v59  ;;  %v1178_v44 = vadd.f32 %v1177_v31, %v1106_v4 }
 0x4ac   :  { %v1463_v0 = vpop.f32.mrf.mxu1  ;;  %v1452_v34 = vpop.f32.mrf.mxu0 }
 0x4ad   :  { %v1263_v12 = vand.u32 2147483647, %v1260_v56  ;;  %vm1268_vm0 = vcmp.ge.f32.partialorder %v1260_v56, 0.0  ;;  %v1276_v58 = vsub.f32 %v2036_v16, %v1178_v44  ;;  %v1272_v37 = vmin.f32 %v1260_v56, 0.0 }
 0x4ae   :  { %v659_v16 = vrot.slane %v658_v17, 1 }
 0x4af   :  { %v1264_v27 = vsub.f32 0.0, %v1263_v12 }
 0x4b0   :  { %v660_v21 = vadd.f32 %v659_v16, %v658_v17 }
 0x4b1   :  { %v1265_v19 = vmul.f32 1.442695, %v1264_v27 }
 0x4b3   :  { %1567 = vpow2.f32 %v1265_v19 }
 0x4c0   :  { %v1568_v11 = vpop.eup %1567 }
 0x4c1   :  { %v1267_v28 = vadd.f32 1.0, %v1568_v11  ;;  %v1269_v29 = vsel %vm1268_vm0, 1.0, %v1568_v11 }
 0x4c3   :  { %1569 = vrcp.f32 %v1267_v28 }
 0x4c4   :  { %1571 = vlog2.f32 %v1267_v28 }
 0x4d0   :  { %v1570_v62 = vpop.eup %1569 }
 0x4d1   :  { %v1572_v38 = vpop.eup %1571  ;;  %v1271_v14 = vmul.f32 %v1570_v62, %v1269_v29 }
 0x4d2   :  { %v1274_v6 = vmul.f32 0.6931472, %v1572_v38 }
 0x4d3   :  { %v1277_v13 = vmul.f32 %v1276_v58, %v1271_v14 }
 0x4d4   :  { %v1275_v53 = vsub.f32 %v1272_v37, %v1274_v6 }
 0x4d5   :  { %v1278_v24 = vadd.f32 %v1277_v13, %v1178_v44 }
 0x4d6   :  { %v1279_v35 = vsel %vm653_vm4, %v1275_v53, 0.0 }
 0x4d7   :  { %v1280_v54 = vrot.slane %v1279_v35, 4  ;;  %1287 = vst.msk [vmem:[%s2134_s10] sm:$0xff] %vm653_vm4, %v1278_v24 }
 0x4d9   :  { %v1281_v52 = vadd.f32 %v1280_v54, %v1279_v35 }
 0x4db   :  { %v1282_v40 = vrot.slane %v1281_v52, 2 }
 0x4dd   :  { %v1283_v51 = vadd.f32 %v1282_v40, %v1281_v52 }
 0x4df   :  { %v1284_v15 = vrot.slane %v1283_v51, 1 }
 0x4e1   :  { %v1285_v49 = vadd.f32 %v1284_v15, %v1283_v51 }
 0x4e3   :  { %v1286_v32 = vadd.f32 %v1285_v49, %v660_v21 }
 0x4e5   :  { %1289 = vst.msk [vmem:[#allocation2] sm:$0x1] %vm1288_vm5, %v1286_v32 }
 0x4e6   :  { %1584 = shalt.err (!%p1581_p4)
}
 0x4e7   :  { %1301 = dma.vmem_to_hbm [thread:$0]  %s1299_s20, 16, %s2135_s11, [#allocation3]  }
 0x4e8   :  { %1593 = dma.done.wait [#allocation3], 16  }
 0x4e9   :  { %1594 = vsyncadd [#allocation3], 4294967280 }
 0x4ea   :  { %1307 = vsyncpa [#allocation3], 1 }

</bundles_post_ra>
